<compile_context>
chip_gen: v7x
topology: tpu7x:2x2x1
jax: 0.10.0
libtpu: 0.0.40
codegen_flags: <defaults>
</compile_context>

<pallas_src>
import functools

import jax
import jax.numpy as jnp
from jax.experimental import pallas as pl
from jax.experimental.pallas import tpu as pltpu

LPAD = 8  # f32 sublane tile: the padded-scratch interior starts tile-aligned


# ----------------------------------------------------------------------------
# Fused kernel
# ----------------------------------------------------------------------------
def _disc_head_kernel(x_ref, w_ref, w4_ref, lb_ref, o_ref, xpad_ref, strips_ref,
                      *, H, W, C):
    # x_ref     : (NB, H, W, C)           bf16  input activation block
    # w_ref     : (3, 3, 3C, C)           bf16  conv1..3 weights [layer, ky, kx*C+ci, co]
    # w4_ref    : (3, 1, 3C)              f32   folded conv4*linear/HW weight [ky, 1, kx*C+ci]
    # lb_ref    : (1,)                    f32   linear bias (SMEM)
    # o_ref     : (1, NB, 1)              f32   sigmoid output for this grid step
    # xpad_ref  : (NB, H+2, LPAD+W+1, C)  f32   activation + halo (interior at [1:H+1, LPAD:LPAD+W])
    # strips_ref: (NB, H+2, W, 3C)        f32   kx-grouped im2col strips
    NB = x_ref.shape[0]
    M = NB * H * W
    K3 = 3 * C

    # ---- zero ONLY the halo cells the conv reads.  Re-done every grid step on
    # purpose: scratch is per-core and uninitialized on each core's first step,
    # and gating on program_id(0)==0 would break under megacore sharding. ----
    zcol = jnp.zeros((NB, H + 2, 1, C), jnp.float32)
    xpad_ref[:, :, LPAD - 1:LPAD, :] = zcol                 # left halo column
    xpad_ref[:, :, LPAD + W:LPAD + W + 1, :] = zcol         # right halo column
    zrow = jnp.zeros((NB, 1, W, C), jnp.float32)
    xpad_ref[:, 0:1, LPAD:LPAD + W, :] = zrow               # top halo row
    xpad_ref[:, H + 1:H + 2, LPAD:LPAD + W, :] = zrow       # bottom halo row

    # Interior write is sublane-aligned (W offset LPAD = 8, width W).
    xpad_ref[:, 1:H + 1, LPAD:LPAD + W, :] = x_ref[...].astype(jnp.float32)

    def load_strips():
        # The ONLY real sublane data movement per layer: 3 kx-shifted copies.
        for kx in range(3):
            strips_ref[:, :, :, kx * C:(kx + 1) * C] = (
                xpad_ref[:, :, LPAD - 1 + kx:LPAD - 1 + kx + W, :])

    # ---- conv layers 1..3: each = 3 accumulated (M,3C) x (3C,C) MXU matmuls;
    # the per-ky LHS is a free outer-dim slice of the strips scratch. ----
    n_full_layers = w_ref.shape[0]
    for layer in range(n_full_layers):
        load_strips()
        acc = jnp.zeros((M, C), jnp.float32)
        for ky in range(3):
            lhs = strips_ref[:, ky:ky + H, :, :].reshape(M, K3)
            acc = acc + jnp.dot(lhs.astype(jnp.bfloat16), w_ref[layer, ky],
                                preferred_element_type=jnp.float32)
        # Aligned full-tile interior writeback; halo stays zero (= padding=1).
        xpad_ref[:, 1:H + 1, LPAD:LPAD + W, :] = acc.reshape(NB, H, W, C)

    # ---- conv4 + AdaptiveAvgPool2d((1,1)) + flatten + Linear(C,1), folded into
    # one (3C,) vector per ky: VPU dot + small sublane (HW) reduce. ----
    load_strips()
    vec = jnp.zeros((M, 1), jnp.float32)
    for ky in range(3):
        lhs = strips_ref[:, ky:ky + H, :, :].reshape(M, K3)
        vec = vec + jnp.sum(lhs * w4_ref[ky], axis=-1, keepdims=True)
    logit = jnp.sum(vec.reshape(NB, H * W, 1), axis=1) + lb_ref[0]    # (NB, 1)
    # Exact sigmoid (approx reciprocal buys nothing on an (NB,1) tensor).
    o_ref[...] = (1.0 / (1.0 + jnp.exp(-logit))).reshape(o_ref.shape)


# ----------------------------------------------------------------------------
# VMEM model + batch-block selection (generation-aware-ish)
# ----------------------------------------------------------------------------
def _vmem_bytes(nb, H, W, C):
    """Rough per-grid-step VMEM footprint in bytes."""
    wp = LPAD + W + 1
    m = nb * H * W
    return int(
        2 * nb * H * W * C * 2            # input block, bf16, double-buffered
        + nb * (H + 2) * wp * C * 4       # xpad scratch (f32)
        + nb * (H + 2) * W * 3 * C * 4    # strips scratch (f32)
        + 4 * 9 * C * C * 4               # weight stack + folded last-layer vec
        + 2 * m * (3 * C + C) * 4         # transient matmul LHS / acc values
    )


def _vmem_budget_bytes():
    try:  # v7x has 64 MiB/core vs 128 MiB on v5e/v6e; leave compiler headroom
        return int(pltpu.get_tpu_info().vmem_capacity_bytes * 0.5)
    except Exception:
        return 16 << 20


def _pick_batch_block(N, H, W, C, *, target_m=256):
    """Fold images into the matmul M dim (target ~256 rows for v6e/v7x MXUs)
    while staying under the VMEM budget AND keeping >= 2 grid steps whenever
    the batch allows, so the 'parallel' axis can shard across v7x's 2 cores."""
    budget = _vmem_budget_bytes()
    best = 1
    for nb in range(1, N + 1):
        if N % nb:
            continue
        if N >= 2 and N // nb < 2:        # keep the megacore axis populated
            break
        if _vmem_bytes(nb, H, W, C) > budget:
            break
        best = nb
        if nb * H * W >= target_m:
            break
    return best


def _const_block_spec(shape):
    """Full-array BlockSpec with a constant index_map; single-buffered when the
    installed Pallas supports pipeline_mode (the block never changes)."""
    nd = len(shape)
    index_map = lambda i, _nd=nd: (0,) * _nd
    try:
        return pl.BlockSpec(shape, index_map, pipeline_mode=pl.Buffered(1))
    except TypeError:  # older Pallas without pipeline_mode kwarg
        return pl.BlockSpec(shape, index_map)


# ----------------------------------------------------------------------------
# Wrapper
# ----------------------------------------------------------------------------
def discriminator_head_forward(params, Q, qx1_nchw):
    del Q  # unused by the reference forward
    N, C, H, W = qx1_nchw.shape
    # NCHW -> NHWC; DMA the input as bf16 (halves input HBM->VMEM bytes).
    x = jnp.transpose(qx1_nchw, (0, 2, 3, 1)).astype(jnp.bfloat16)

    # conv1..3 weights -> (3, 3, 3C, C): [layer, ky, kx*C+ci, co], bf16 MXU RHS.
    w_stack = jnp.stack(
        [w.reshape(3, 3 * C, C) for w in params["conv_ws"][:3]], axis=0
    ).astype(jnp.bfloat16)
    # conv4 (+) avgpool (+) linear folded:
    #   w4_eff[ky, 0, kx*C+ci] = (1/(H*W)) * sum_co conv4[ky,kx,ci,co]*lin_w[0,co]
    w4 = params["conv_ws"][3].reshape(3, 3 * C, C).astype(jnp.float32)
    lw = params["lin_w"].reshape(C, 1).astype(jnp.float32)
    w4_eff = (jnp.matmul(w4, lw) / float(H * W)).reshape(3, 1, 3 * C)
    lb = params["lin_b"].reshape(1).astype(jnp.float32)

    NB = _pick_batch_block(N, H, W, C)
    G = N // NB
    kernel = functools.partial(_disc_head_kernel, H=H, W=W, C=C)
    out = pl.pallas_call(
        kernel,
        out_shape=jax.ShapeDtypeStruct((G, NB, 1), jnp.float32),
        grid_spec=pltpu.PrefetchScalarGridSpec(
            num_scalar_prefetch=0,
            grid=(G,),
            in_specs=[
                pl.BlockSpec((NB, H, W, C), lambda i: (i, 0, 0, 0)),
                _const_block_spec((3, 3, 3 * C, C)),
                _const_block_spec((3, 1, 3 * C)),
                pl.BlockSpec(memory_space=pltpu.MemorySpace.SMEM),
            ],
            out_specs=pl.BlockSpec((1, NB, 1), lambda i: (i, 0, 0)),
            scratch_shapes=[
                pltpu.VMEM((NB, H + 2, LPAD + W + 1, C), jnp.float32),
                pltpu.VMEM((NB, H + 2, W, 3 * C), jnp.float32),
            ],
        ),
        compiler_params=pltpu.CompilerParams(
            dimension_semantics=("parallel",),
            vmem_limit_bytes=int(min(max(2 * _vmem_bytes(NB, H, W, C), 16 << 20),
                                     32 << 20)),
        ),
    )(x, w_stack, w4_eff, lb)
    return out.reshape(N, 1)


# ----------------------------------------------------------------------------
# Parameter setup + pure-JAX reference for verification
# ----------------------------------------------------------------------------
def init_params(key, C):
    ks = jax.random.split(key, 6)
    conv_scale = 1.0 / (3.0 * float(C) ** 0.5)
    conv_ws = [
        jax.random.normal(ks[i], (3, 3, C, C), jnp.float32) * conv_scale
        for i in range(4)
    ]  # HWIO; PyTorch stores (Cout, Cin, 3, 3) - same values, different layout
    lin_w = jax.random.normal(ks[4], (1, C), jnp.float32) / float(C) ** 0.5
    lin_b = jax.random.normal(ks[5], (1,), jnp.float32) * 0.1
    return {"conv_ws": conv_ws, "lin_w": lin_w, "lin_b": lin_b}


def reference_forward(params, qx1_nchw):
    """Pure-JAX reference (conv x4 -> avgpool -> linear -> sigmoid)."""
    x = jnp.transpose(qx1_nchw, (0, 2, 3, 1)).astype(jnp.float32)
    for w in params["conv_ws"]:
        x = jax.lax.conv_general_dilated(
            x, w, window_strides=(1, 1), padding="SAME",
            dimension_numbers=("NHWC", "HWIO", "NHWC"))
    pooled = jnp.mean(x, axis=(1, 2))
    logit = pooled @ params["lin_w"].T + params["lin_b"]
    return jax.nn.sigmoid(logit)


if __name__ == "__main__":
    C, N, H, W = 64, 2, 8, 8
    root = jax.random.PRNGKey(0)
    k_param, k_q, k_x = jax.random.split(root, 3)

    params = init_params(k_param, C)
    Q = jax.random.normal(k_q, (N, 4), jnp.float32)                # unused input
    qx1 = jax.random.normal(k_x, (N, C, H, W), jnp.float32) * 0.1  # NCHW

    out = jax.block_until_ready(discriminator_head_forward(params, Q, qx1))
    ref = jax.block_until_ready(reference_forward(params, qx1))

    assert out.shape == (N, 1) and out.dtype == jnp.float32
    max_err = float(jnp.max(jnp.abs(out - ref)))
    # bf16 input DMA + bf16 MXU operands, but f32 inter-layer activations and
    # f32 accumulation; tolerance covers the bf16 rounding of the inputs.
    assert max_err < 3e-3, f"mismatch vs reference: {max_err}"

    print("KERNEL_OK")
</pallas_src>

<mosaic_0001>
module attributes {stable_mosaic.version = 11 : i64} {
  func.func @_disc_head_kernel(%arg0: i32, %arg1: memref<1x8x8x64xbf16, #tpu.memory_space<vmem>>, %arg2: memref<3x3x192x64xbf16, #tpu.memory_space<vmem>>, %arg3: memref<3x1x192xf32, #tpu.memory_space<vmem>>, %arg4: memref<1xf32, #tpu.memory_space<smem>>, %arg5: memref<1x1x1xf32, #tpu.memory_space<vmem>>, %arg6: memref<1x10x17x64xf32, #tpu.memory_space<vmem>>, %arg7: memref<1x10x8x192xf32, #tpu.memory_space<vmem>>) attributes {dimension_semantics = [#tpu.dimension_semantics<parallel>], iteration_bounds = array<i64: 2>, scalar_prefetch = 0 : i64, scratch_operands = 2 : i64, tpu.core_type = #tpu.core_type<tc>, window_params = [{transform_indices = @transform_0, window_bounds = array<i64: 1, 8, 8, 64>}, {pipeline_mode = #tpu.pipeline_mode<synchronous>, transform_indices = @transform_1, window_bounds = array<i64: 3, 3, 192, 64>}, {pipeline_mode = #tpu.pipeline_mode<synchronous>, transform_indices = @transform_2, window_bounds = array<i64: 3, 1, 192>}, {transform_indices = @transform_3, window_bounds = array<i64: 1>}, {transform_indices = @transform_4, window_bounds = array<i64: 1, 1, 1>}]} {
    %cst = arith.constant 0.000000e+00 : f32
    %0 = vector.broadcast %cst : f32 to vector<1x10x1x64xf32>
    %c0 = arith.constant 0 : index
    %c0_0 = arith.constant 0 : index
    %c7 = arith.constant 7 : index
    %c0_1 = arith.constant 0 : index
    %1 = vector.load %arg6[%c0, %c0_0, %c7, %c0_1] : memref<1x10x17x64xf32, #tpu.memory_space<vmem>>, vector<1x10x1x64xf32>
    tpu.vector_store %arg6[%c0, %c0_0, %c7, %c0_1], %0 {strides = array<i32>} : memref<1x10x17x64xf32, #tpu.memory_space<vmem>>, vector<1x10x1x64xf32>,
    %c0_2 = arith.constant 0 : index
    %c0_3 = arith.constant 0 : index
    %c16 = arith.constant 16 : index
    %c0_4 = arith.constant 0 : index
    %2 = vector.load %arg6[%c0_2, %c0_3, %c16, %c0_4] : memref<1x10x17x64xf32, #tpu.memory_space<vmem>>, vector<1x10x1x64xf32>
    tpu.vector_store %arg6[%c0_2, %c0_3, %c16, %c0_4], %0 {strides = array<i32>} : memref<1x10x17x64xf32, #tpu.memory_space<vmem>>, vector<1x10x1x64xf32>,
    %cst_5 = arith.constant 0.000000e+00 : f32
    %3 = vector.broadcast %cst_5 : f32 to vector<1x1x8x64xf32>
    %c0_6 = arith.constant 0 : index
    %c0_7 = arith.constant 0 : index
    %c8 = arith.constant 8 : index
    %c0_8 = arith.constant 0 : index
    %4 = vector.load %arg6[%c0_6, %c0_7, %c8, %c0_8] : memref<1x10x17x64xf32, #tpu.memory_space<vmem>>, vector<1x1x8x64xf32>
    tpu.vector_store %arg6[%c0_6, %c0_7, %c8, %c0_8], %3 {strides = array<i32>} : memref<1x10x17x64xf32, #tpu.memory_space<vmem>>, vector<1x1x8x64xf32>,
    %c0_9 = arith.constant 0 : index
    %c9 = arith.constant 9 : index
    %c8_10 = arith.constant 8 : index
    %c0_11 = arith.constant 0 : index
    %5 = vector.load %arg6[%c0_9, %c9, %c8_10, %c0_11] : memref<1x10x17x64xf32, #tpu.memory_space<vmem>>, vector<1x1x8x64xf32>
    tpu.vector_store %arg6[%c0_9, %c9, %c8_10, %c0_11], %3 {strides = array<i32>} : memref<1x10x17x64xf32, #tpu.memory_space<vmem>>, vector<1x1x8x64xf32>,
    %c0_12 = arith.constant 0 : index
    %c0_13 = arith.constant 0 : index
    %c0_14 = arith.constant 0 : index
    %c0_15 = arith.constant 0 : index
    %6 = vector.load %arg1[%c0_12, %c0_13, %c0_14, %c0_15] : memref<1x8x8x64xbf16, #tpu.memory_space<vmem>>, vector<1x8x8x64xbf16>
    %7 = arith.extf %6 : vector<1x8x8x64xbf16> to vector<1x8x8x64xf32>
    %c0_16 = arith.constant 0 : index
    %c1 = arith.constant 1 : index
    %c8_17 = arith.constant 8 : index
    %c0_18 = arith.constant 0 : index
    %8 = vector.load %arg6[%c0_16, %c1, %c8_17, %c0_18] : memref<1x10x17x64xf32, #tpu.memory_space<vmem>>, vector<1x8x8x64xf32>
    tpu.vector_store %arg6[%c0_16, %c1, %c8_17, %c0_18], %7 {strides = array<i32>} : memref<1x10x17x64xf32, #tpu.memory_space<vmem>>, vector<1x8x8x64xf32>,
    %c0_19 = arith.constant 0 : index
    %c0_20 = arith.constant 0 : index
    %c7_21 = arith.constant 7 : index
    %c0_22 = arith.constant 0 : index
    %9 = vector.load %arg6[%c0_19, %c0_20, %c7_21, %c0_22] : memref<1x10x17x64xf32, #tpu.memory_space<vmem>>, vector<1x10x8x64xf32>
    %c0_23 = arith.constant 0 : index
    %c0_24 = arith.constant 0 : index
    %c0_25 = arith.constant 0 : index
    %c0_26 = arith.constant 0 : index
    %10 = vector.load %arg7[%c0_23, %c0_24, %c0_25, %c0_26] : memref<1x10x8x192xf32, #tpu.memory_space<vmem>>, vector<1x10x8x64xf32>
    tpu.vector_store %arg7[%c0_23, %c0_24, %c0_25, %c0_26], %9 {strides = array<i32>} : memref<1x10x8x192xf32, #tpu.memory_space<vmem>>, vector<1x10x8x64xf32>,
    %c0_27 = arith.constant 0 : index
    %c0_28 = arith.constant 0 : index
    %c8_29 = arith.constant 8 : index
    %c0_30 = arith.constant 0 : index
    %11 = vector.load %arg6[%c0_27, %c0_28, %c8_29, %c0_30] : memref<1x10x17x64xf32, #tpu.memory_space<vmem>>, vector<1x10x8x64xf32>
    %c0_31 = arith.constant 0 : index
    %c0_32 = arith.constant 0 : index
    %c0_33 = arith.constant 0 : index
    %c64 = arith.constant 64 : index
    %12 = vector.load %arg7[%c0_31, %c0_32, %c0_33, %c64] : memref<1x10x8x192xf32, #tpu.memory_space<vmem>>, vector<1x10x8x64xf32>
    tpu.vector_store %arg7[%c0_31, %c0_32, %c0_33, %c64], %11 {strides = array<i32>} : memref<1x10x8x192xf32, #tpu.memory_space<vmem>>, vector<1x10x8x64xf32>,
    %c0_34 = arith.constant 0 : index
    %c0_35 = arith.constant 0 : index
    %c9_36 = arith.constant 9 : index
    %c0_37 = arith.constant 0 : index
    %13 = vector.load %arg6[%c0_34, %c0_35, %c9_36, %c0_37] : memref<1x10x17x64xf32, #tpu.memory_space<vmem>>, vector<1x10x8x64xf32>
    %c0_38 = arith.constant 0 : index
    %c0_39 = arith.constant 0 : index
    %c0_40 = arith.constant 0 : index
    %c128 = arith.constant 128 : index
    %14 = vector.load %arg7[%c0_38, %c0_39, %c0_40, %c128] : memref<1x10x8x192xf32, #tpu.memory_space<vmem>>, vector<1x10x8x64xf32>
    tpu.vector_store %arg7[%c0_38, %c0_39, %c0_40, %c128], %13 {strides = array<i32>} : memref<1x10x8x192xf32, #tpu.memory_space<vmem>>, vector<1x10x8x64xf32>,
    %cst_41 = arith.constant 0.000000e+00 : f32
    %15 = vector.broadcast %cst_41 : f32 to vector<64x64xf32>
    %c0_42 = arith.constant 0 : index
    %c0_43 = arith.constant 0 : index
    %c0_44 = arith.constant 0 : index
    %c0_45 = arith.constant 0 : index
    %16 = vector.load %arg7[%c0_42, %c0_43, %c0_44, %c0_45] : memref<1x10x8x192xf32, #tpu.memory_space<vmem>>, vector<1x8x8x192xf32>
    %17 = vector.shape_cast %16 : vector<1x8x8x192xf32> to vector<64x192xf32>
    %18 = arith.truncf %17 : vector<64x192xf32> to vector<64x192xbf16>
    %c0_46 = arith.constant 0 : index
    %c0_47 = arith.constant 0 : index
    %c0_48 = arith.constant 0 : index
    %c0_49 = arith.constant 0 : index
    %19 = vector.load %arg2[%c0_46, %c0_47, %c0_48, %c0_49] : memref<3x3x192x64xbf16, #tpu.memory_space<vmem>>, vector<1x1x192x64xbf16>
    %20 = vector.shape_cast %19 : vector<1x1x192x64xbf16> to vector<192x64xbf16>
    %cst_50 = arith.constant dense<0.000000e+00> : vector<64x64xf32>
    %21 = tpu.matmul %18, %20, %cst_50 {dimension_numbers = #tpu.dot_dimension_numbers<[1], [0], [0], [1], [0, 0, 1, 1], [], []>} : vector<64x192xbf16>, vector<192x64xbf16>, vector<64x64xf32> -> vector<64x64xf32>
    %22 = arith.addf %15, %21 : vector<64x64xf32>
    %c0_51 = arith.constant 0 : index
    %c1_52 = arith.constant 1 : index
    %c0_53 = arith.constant 0 : index
    %c0_54 = arith.constant 0 : index
    %23 = vector.load %arg7[%c0_51, %c1_52, %c0_53, %c0_54] : memref<1x10x8x192xf32, #tpu.memory_space<vmem>>, vector<1x8x8x192xf32>
    %24 = vector.shape_cast %23 : vector<1x8x8x192xf32> to vector<64x192xf32>
    %25 = arith.truncf %24 : vector<64x192xf32> to vector<64x192xbf16>
    %c0_55 = arith.constant 0 : index
    %c1_56 = arith.constant 1 : index
    %c0_57 = arith.constant 0 : index
    %c0_58 = arith.constant 0 : index
    %26 = vector.load %arg2[%c0_55, %c1_56, %c0_57, %c0_58] : memref<3x3x192x64xbf16, #tpu.memory_space<vmem>>, vector<1x1x192x64xbf16>
    %27 = vector.shape_cast %26 : vector<1x1x192x64xbf16> to vector<192x64xbf16>
    %cst_59 = arith.constant dense<0.000000e+00> : vector<64x64xf32>
    %28 = tpu.matmul %25, %27, %cst_59 {dimension_numbers = #tpu.dot_dimension_numbers<[1], [0], [0], [1], [0, 0, 1, 1], [], []>} : vector<64x192xbf16>, vector<192x64xbf16>, vector<64x64xf32> -> vector<64x64xf32>
    %29 = arith.addf %22, %28 : vector<64x64xf32>
    %c0_60 = arith.constant 0 : index
    %c2 = arith.constant 2 : index
    %c0_61 = arith.constant 0 : index
    %c0_62 = arith.constant 0 : index
    %30 = vector.load %arg7[%c0_60, %c2, %c0_61, %c0_62] : memref<1x10x8x192xf32, #tpu.memory_space<vmem>>, vector<1x8x8x192xf32>
    %31 = vector.shape_cast %30 : vector<1x8x8x192xf32> to vector<64x192xf32>
    %32 = arith.truncf %31 : vector<64x192xf32> to vector<64x192xbf16>
    %c0_63 = arith.constant 0 : index
    %c2_64 = arith.constant 2 : index
    %c0_65 = arith.constant 0 : index
    %c0_66 = arith.constant 0 : index
    %33 = vector.load %arg2[%c0_63, %c2_64, %c0_65, %c0_66] : memref<3x3x192x64xbf16, #tpu.memory_space<vmem>>, vector<1x1x192x64xbf16>
    %34 = vector.shape_cast %33 : vector<1x1x192x64xbf16> to vector<192x64xbf16>
    %cst_67 = arith.constant dense<0.000000e+00> : vector<64x64xf32>
    %35 = tpu.matmul %32, %34, %cst_67 {dimension_numbers = #tpu.dot_dimension_numbers<[1], [0], [0], [1], [0, 0, 1, 1], [], []>} : vector<64x192xbf16>, vector<192x64xbf16>, vector<64x64xf32> -> vector<64x64xf32>
    %36 = arith.addf %29, %35 : vector<64x64xf32>
    %37 = vector.shape_cast %36 : vector<64x64xf32> to vector<1x8x8x64xf32>
    %c0_68 = arith.constant 0 : index
    %c1_69 = arith.constant 1 : index
    %c8_70 = arith.constant 8 : index
    %c0_71 = arith.constant 0 : index
    %38 = vector.load %arg6[%c0_68, %c1_69, %c8_70, %c0_71] : memref<1x10x17x64xf32, #tpu.memory_space<vmem>>, vector<1x8x8x64xf32>
    tpu.vector_store %arg6[%c0_68, %c1_69, %c8_70, %c0_71], %37 {strides = array<i32>} : memref<1x10x17x64xf32, #tpu.memory_space<vmem>>, vector<1x8x8x64xf32>,
    %c0_72 = arith.constant 0 : index
    %c0_73 = arith.constant 0 : index
    %c7_74 = arith.constant 7 : index
    %c0_75 = arith.constant 0 : index
    %39 = vector.load %arg6[%c0_72, %c0_73, %c7_74, %c0_75] : memref<1x10x17x64xf32, #tpu.memory_space<vmem>>, vector<1x10x8x64xf32>
    %c0_76 = arith.constant 0 : index
    %c0_77 = arith.constant 0 : index
    %c0_78 = arith.constant 0 : index
    %c0_79 = arith.constant 0 : index
    %40 = vector.load %arg7[%c0_76, %c0_77, %c0_78, %c0_79] : memref<1x10x8x192xf32, #tpu.memory_space<vmem>>, vector<1x10x8x64xf32>
    tpu.vector_store %arg7[%c0_76, %c0_77, %c0_78, %c0_79], %39 {strides = array<i32>} : memref<1x10x8x192xf32, #tpu.memory_space<vmem>>, vector<1x10x8x64xf32>,
    %c0_80 = arith.constant 0 : index
    %c0_81 = arith.constant 0 : index
    %c8_82 = arith.constant 8 : index
    %c0_83 = arith.constant 0 : index
    %41 = vector.load %arg6[%c0_80, %c0_81, %c8_82, %c0_83] : memref<1x10x17x64xf32, #tpu.memory_space<vmem>>, vector<1x10x8x64xf32>
    %c0_84 = arith.constant 0 : index
    %c0_85 = arith.constant 0 : index
    %c0_86 = arith.constant 0 : index
    %c64_87 = arith.constant 64 : index
    %42 = vector.load %arg7[%c0_84, %c0_85, %c0_86, %c64_87] : memref<1x10x8x192xf32, #tpu.memory_space<vmem>>, vector<1x10x8x64xf32>
    tpu.vector_store %arg7[%c0_84, %c0_85, %c0_86, %c64_87], %41 {strides = array<i32>} : memref<1x10x8x192xf32, #tpu.memory_space<vmem>>, vector<1x10x8x64xf32>,
    %c0_88 = arith.constant 0 : index
    %c0_89 = arith.constant 0 : index
    %c9_90 = arith.constant 9 : index
    %c0_91 = arith.constant 0 : index
    %43 = vector.load %arg6[%c0_88, %c0_89, %c9_90, %c0_91] : memref<1x10x17x64xf32, #tpu.memory_space<vmem>>, vector<1x10x8x64xf32>
    %c0_92 = arith.constant 0 : index
    %c0_93 = arith.constant 0 : index
    %c0_94 = arith.constant 0 : index
    %c128_95 = arith.constant 128 : index
    %44 = vector.load %arg7[%c0_92, %c0_93, %c0_94, %c128_95] : memref<1x10x8x192xf32, #tpu.memory_space<vmem>>, vector<1x10x8x64xf32>
    tpu.vector_store %arg7[%c0_92, %c0_93, %c0_94, %c128_95], %43 {strides = array<i32>} : memref<1x10x8x192xf32, #tpu.memory_space<vmem>>, vector<1x10x8x64xf32>,
    %cst_96 = arith.constant 0.000000e+00 : f32
    %45 = vector.broadcast %cst_96 : f32 to vector<64x64xf32>
    %c0_97 = arith.constant 0 : index
    %c0_98 = arith.constant 0 : index
    %c0_99 = arith.constant 0 : index
    %c0_100 = arith.constant 0 : index
    %46 = vector.load %arg7[%c0_97, %c0_98, %c0_99, %c0_100] : memref<1x10x8x192xf32, #tpu.memory_space<vmem>>, vector<1x8x8x192xf32>
    %47 = vector.shape_cast %46 : vector<1x8x8x192xf32> to vector<64x192xf32>
    %48 = arith.truncf %47 : vector<64x192xf32> to vector<64x192xbf16>
    %c1_101 = arith.constant 1 : index
    %c0_102 = arith.constant 0 : index
    %c0_103 = arith.constant 0 : index
    %c0_104 = arith.constant 0 : index
    %49 = vector.load %arg2[%c1_101, %c0_102, %c0_103, %c0_104] : memref<3x3x192x64xbf16, #tpu.memory_space<vmem>>, vector<1x1x192x64xbf16>
    %50 = vector.shape_cast %49 : vector<1x1x192x64xbf16> to vector<192x64xbf16>
    %cst_105 = arith.constant dense<0.000000e+00> : vector<64x64xf32>
    %51 = tpu.matmul %48, %50, %cst_105 {dimension_numbers = #tpu.dot_dimension_numbers<[1], [0], [0], [1], [0, 0, 1, 1], [], []>} : vector<64x192xbf16>, vector<192x64xbf16>, vector<64x64xf32> -> vector<64x64xf32>
    %52 = arith.addf %45, %51 : vector<64x64xf32>
    %c0_106 = arith.constant 0 : index
    %c1_107 = arith.constant 1 : index
    %c0_108 = arith.constant 0 : index
    %c0_109 = arith.constant 0 : index
    %53 = vector.load %arg7[%c0_106, %c1_107, %c0_108, %c0_109] : memref<1x10x8x192xf32, #tpu.memory_space<vmem>>, vector<1x8x8x192xf32>
    %54 = vector.shape_cast %53 : vector<1x8x8x192xf32> to vector<64x192xf32>
    %55 = arith.truncf %54 : vector<64x192xf32> to vector<64x192xbf16>
    %c1_110 = arith.constant 1 : index
    %c1_111 = arith.constant 1 : index
    %c0_112 = arith.constant 0 : index
    %c0_113 = arith.constant 0 : index
    %56 = vector.load %arg2[%c1_110, %c1_111, %c0_112, %c0_113] : memref<3x3x192x64xbf16, #tpu.memory_space<vmem>>, vector<1x1x192x64xbf16>
    %57 = vector.shape_cast %56 : vector<1x1x192x64xbf16> to vector<192x64xbf16>
    %cst_114 = arith.constant dense<0.000000e+00> : vector<64x64xf32>
    %58 = tpu.matmul %55, %57, %cst_114 {dimension_numbers = #tpu.dot_dimension_numbers<[1], [0], [0], [1], [0, 0, 1, 1], [], []>} : vector<64x192xbf16>, vector<192x64xbf16>, vector<64x64xf32> -> vector<64x64xf32>
    %59 = arith.addf %52, %58 : vector<64x64xf32>
    %c0_115 = arith.constant 0 : index
    %c2_116 = arith.constant 2 : index
    %c0_117 = arith.constant 0 : index
    %c0_118 = arith.constant 0 : index
    %60 = vector.load %arg7[%c0_115, %c2_116, %c0_117, %c0_118] : memref<1x10x8x192xf32, #tpu.memory_space<vmem>>, vector<1x8x8x192xf32>
    %61 = vector.shape_cast %60 : vector<1x8x8x192xf32> to vector<64x192xf32>
    %62 = arith.truncf %61 : vector<64x192xf32> to vector<64x192xbf16>
    %c1_119 = arith.constant 1 : index
    %c2_120 = arith.constant 2 : index
    %c0_121 = arith.constant 0 : index
    %c0_122 = arith.constant 0 : index
    %63 = vector.load %arg2[%c1_119, %c2_120, %c0_121, %c0_122] : memref<3x3x192x64xbf16, #tpu.memory_space<vmem>>, vector<1x1x192x64xbf16>
    %64 = vector.shape_cast %63 : vector<1x1x192x64xbf16> to vector<192x64xbf16>
    %cst_123 = arith.constant dense<0.000000e+00> : vector<64x64xf32>
    %65 = tpu.matmul %62, %64, %cst_123 {dimension_numbers = #tpu.dot_dimension_numbers<[1], [0], [0], [1], [0, 0, 1, 1], [], []>} : vector<64x192xbf16>, vector<192x64xbf16>, vector<64x64xf32> -> vector<64x64xf32>
    %66 = arith.addf %59, %65 : vector<64x64xf32>
    %67 = vector.shape_cast %66 : vector<64x64xf32> to vector<1x8x8x64xf32>
    %c0_124 = arith.constant 0 : index
    %c1_125 = arith.constant 1 : index
    %c8_126 = arith.constant 8 : index
    %c0_127 = arith.constant 0 : index
    %68 = vector.load %arg6[%c0_124, %c1_125, %c8_126, %c0_127] : memref<1x10x17x64xf32, #tpu.memory_space<vmem>>, vector<1x8x8x64xf32>
    tpu.vector_store %arg6[%c0_124, %c1_125, %c8_126, %c0_127], %67 {strides = array<i32>} : memref<1x10x17x64xf32, #tpu.memory_space<vmem>>, vector<1x8x8x64xf32>,
    %c0_128 = arith.constant 0 : index
    %c0_129 = arith.constant 0 : index
    %c7_130 = arith.constant 7 : index
    %c0_131 = arith.constant 0 : index
    %69 = vector.load %arg6[%c0_128, %c0_129, %c7_130, %c0_131] : memref<1x10x17x64xf32, #tpu.memory_space<vmem>>, vector<1x10x8x64xf32>
    %c0_132 = arith.constant 0 : index
    %c0_133 = arith.constant 0 : index
    %c0_134 = arith.constant 0 : index
    %c0_135 = arith.constant 0 : index
    %70 = vector.load %arg7[%c0_132, %c0_133, %c0_134, %c0_135] : memref<1x10x8x192xf32, #tpu.memory_space<vmem>>, vector<1x10x8x64xf32>
    tpu.vector_store %arg7[%c0_132, %c0_133, %c0_134, %c0_135], %69 {strides = array<i32>} : memref<1x10x8x192xf32, #tpu.memory_space<vmem>>, vector<1x10x8x64xf32>,
    %c0_136 = arith.constant 0 : index
    %c0_137 = arith.constant 0 : index
    %c8_138 = arith.constant 8 : index
    %c0_139 = arith.constant 0 : index
    %71 = vector.load %arg6[%c0_136, %c0_137, %c8_138, %c0_139] : memref<1x10x17x64xf32, #tpu.memory_space<vmem>>, vector<1x10x8x64xf32>
    %c0_140 = arith.constant 0 : index
    %c0_141 = arith.constant 0 : index
    %c0_142 = arith.constant 0 : index
    %c64_143 = arith.constant 64 : index
    %72 = vector.load %arg7[%c0_140, %c0_141, %c0_142, %c64_143] : memref<1x10x8x192xf32, #tpu.memory_space<vmem>>, vector<1x10x8x64xf32>
    tpu.vector_store %arg7[%c0_140, %c0_141, %c0_142, %c64_143], %71 {strides = array<i32>} : memref<1x10x8x192xf32, #tpu.memory_space<vmem>>, vector<1x10x8x64xf32>,
    %c0_144 = arith.constant 0 : index
    %c0_145 = arith.constant 0 : index
    %c9_146 = arith.constant 9 : index
    %c0_147 = arith.constant 0 : index
    %73 = vector.load %arg6[%c0_144, %c0_145, %c9_146, %c0_147] : memref<1x10x17x64xf32, #tpu.memory_space<vmem>>, vector<1x10x8x64xf32>
    %c0_148 = arith.constant 0 : index
    %c0_149 = arith.constant 0 : index
    %c0_150 = arith.constant 0 : index
    %c128_151 = arith.constant 128 : index
    %74 = vector.load %arg7[%c0_148, %c0_149, %c0_150, %c128_151] : memref<1x10x8x192xf32, #tpu.memory_space<vmem>>, vector<1x10x8x64xf32>
    tpu.vector_store %arg7[%c0_148, %c0_149, %c0_150, %c128_151], %73 {strides = array<i32>} : memref<1x10x8x192xf32, #tpu.memory_space<vmem>>, vector<1x10x8x64xf32>,
    %cst_152 = arith.constant 0.000000e+00 : f32
    %75 = vector.broadcast %cst_152 : f32 to vector<64x64xf32>
    %c0_153 = arith.constant 0 : index
    %c0_154 = arith.constant 0 : index
    %c0_155 = arith.constant 0 : index
    %c0_156 = arith.constant 0 : index
    %76 = vector.load %arg7[%c0_153, %c0_154, %c0_155, %c0_156] : memref<1x10x8x192xf32, #tpu.memory_space<vmem>>, vector<1x8x8x192xf32>
    %77 = vector.shape_cast %76 : vector<1x8x8x192xf32> to vector<64x192xf32>
    %78 = arith.truncf %77 : vector<64x192xf32> to vector<64x192xbf16>
    %c2_157 = arith.constant 2 : index
    %c0_158 = arith.constant 0 : index
    %c0_159 = arith.constant 0 : index
    %c0_160 = arith.constant 0 : index
    %79 = vector.load %arg2[%c2_157, %c0_158, %c0_159, %c0_160] : memref<3x3x192x64xbf16, #tpu.memory_space<vmem>>, vector<1x1x192x64xbf16>
    %80 = vector.shape_cast %79 : vector<1x1x192x64xbf16> to vector<192x64xbf16>
    %cst_161 = arith.constant dense<0.000000e+00> : vector<64x64xf32>
    %81 = tpu.matmul %78, %80, %cst_161 {dimension_numbers = #tpu.dot_dimension_numbers<[1], [0], [0], [1], [0, 0, 1, 1], [], []>} : vector<64x192xbf16>, vector<192x64xbf16>, vector<64x64xf32> -> vector<64x64xf32>
    %82 = arith.addf %75, %81 : vector<64x64xf32>
    %c0_162 = arith.constant 0 : index
    %c1_163 = arith.constant 1 : index
    %c0_164 = arith.constant 0 : index
    %c0_165 = arith.constant 0 : index
    %83 = vector.load %arg7[%c0_162, %c1_163, %c0_164, %c0_165] : memref<1x10x8x192xf32, #tpu.memory_space<vmem>>, vector<1x8x8x192xf32>
    %84 = vector.shape_cast %83 : vector<1x8x8x192xf32> to vector<64x192xf32>
    %85 = arith.truncf %84 : vector<64x192xf32> to vector<64x192xbf16>
    %c2_166 = arith.constant 2 : index
    %c1_167 = arith.constant 1 : index
    %c0_168 = arith.constant 0 : index
    %c0_169 = arith.constant 0 : index
    %86 = vector.load %arg2[%c2_166, %c1_167, %c0_168, %c0_169] : memref<3x3x192x64xbf16, #tpu.memory_space<vmem>>, vector<1x1x192x64xbf16>
    %87 = vector.shape_cast %86 : vector<1x1x192x64xbf16> to vector<192x64xbf16>
    %cst_170 = arith.constant dense<0.000000e+00> : vector<64x64xf32>
    %88 = tpu.matmul %85, %87, %cst_170 {dimension_numbers = #tpu.dot_dimension_numbers<[1], [0], [0], [1], [0, 0, 1, 1], [], []>} : vector<64x192xbf16>, vector<192x64xbf16>, vector<64x64xf32> -> vector<64x64xf32>
    %89 = arith.addf %82, %88 : vector<64x64xf32>
    %c0_171 = arith.constant 0 : index
    %c2_172 = arith.constant 2 : index
    %c0_173 = arith.constant 0 : index
    %c0_174 = arith.constant 0 : index
    %90 = vector.load %arg7[%c0_171, %c2_172, %c0_173, %c0_174] : memref<1x10x8x192xf32, #tpu.memory_space<vmem>>, vector<1x8x8x192xf32>
    %91 = vector.shape_cast %90 : vector<1x8x8x192xf32> to vector<64x192xf32>
    %92 = arith.truncf %91 : vector<64x192xf32> to vector<64x192xbf16>
    %c2_175 = arith.constant 2 : index
    %c2_176 = arith.constant 2 : index
    %c0_177 = arith.constant 0 : index
    %c0_178 = arith.constant 0 : index
    %93 = vector.load %arg2[%c2_175, %c2_176, %c0_177, %c0_178] : memref<3x3x192x64xbf16, #tpu.memory_space<vmem>>, vector<1x1x192x64xbf16>
    %94 = vector.shape_cast %93 : vector<1x1x192x64xbf16> to vector<192x64xbf16>
    %cst_179 = arith.constant dense<0.000000e+00> : vector<64x64xf32>
    %95 = tpu.matmul %92, %94, %cst_179 {dimension_numbers = #tpu.dot_dimension_numbers<[1], [0], [0], [1], [0, 0, 1, 1], [], []>} : vector<64x192xbf16>, vector<192x64xbf16>, vector<64x64xf32> -> vector<64x64xf32>
    %96 = arith.addf %89, %95 : vector<64x64xf32>
    %97 = vector.shape_cast %96 : vector<64x64xf32> to vector<1x8x8x64xf32>
    %c0_180 = arith.constant 0 : index
    %c1_181 = arith.constant 1 : index
    %c8_182 = arith.constant 8 : index
    %c0_183 = arith.constant 0 : index
    %98 = vector.load %arg6[%c0_180, %c1_181, %c8_182, %c0_183] : memref<1x10x17x64xf32, #tpu.memory_space<vmem>>, vector<1x8x8x64xf32>
    tpu.vector_store %arg6[%c0_180, %c1_181, %c8_182, %c0_183], %97 {strides = array<i32>} : memref<1x10x17x64xf32, #tpu.memory_space<vmem>>, vector<1x8x8x64xf32>,
    %c0_184 = arith.constant 0 : index
    %c0_185 = arith.constant 0 : index
    %c7_186 = arith.constant 7 : index
    %c0_187 = arith.constant 0 : index
    %99 = vector.load %arg6[%c0_184, %c0_185, %c7_186, %c0_187] : memref<1x10x17x64xf32, #tpu.memory_space<vmem>>, vector<1x10x8x64xf32>
    %c0_188 = arith.constant 0 : index
    %c0_189 = arith.constant 0 : index
    %c0_190 = arith.constant 0 : index
    %c0_191 = arith.constant 0 : index
    %100 = vector.load %arg7[%c0_188, %c0_189, %c0_190, %c0_191] : memref<1x10x8x192xf32, #tpu.memory_space<vmem>>, vector<1x10x8x64xf32>
    tpu.vector_store %arg7[%c0_188, %c0_189, %c0_190, %c0_191], %99 {strides = array<i32>} : memref<1x10x8x192xf32, #tpu.memory_space<vmem>>, vector<1x10x8x64xf32>,
    %c0_192 = arith.constant 0 : index
    %c0_193 = arith.constant 0 : index
    %c8_194 = arith.constant 8 : index
    %c0_195 = arith.constant 0 : index
    %101 = vector.load %arg6[%c0_192, %c0_193, %c8_194, %c0_195] : memref<1x10x17x64xf32, #tpu.memory_space<vmem>>, vector<1x10x8x64xf32>
    %c0_196 = arith.constant 0 : index
    %c0_197 = arith.constant 0 : index
    %c0_198 = arith.constant 0 : index
    %c64_199 = arith.constant 64 : index
    %102 = vector.load %arg7[%c0_196, %c0_197, %c0_198, %c64_199] : memref<1x10x8x192xf32, #tpu.memory_space<vmem>>, vector<1x10x8x64xf32>
    tpu.vector_store %arg7[%c0_196, %c0_197, %c0_198, %c64_199], %101 {strides = array<i32>} : memref<1x10x8x192xf32, #tpu.memory_space<vmem>>, vector<1x10x8x64xf32>,
    %c0_200 = arith.constant 0 : index
    %c0_201 = arith.constant 0 : index
    %c9_202 = arith.constant 9 : index
    %c0_203 = arith.constant 0 : index
    %103 = vector.load %arg6[%c0_200, %c0_201, %c9_202, %c0_203] : memref<1x10x17x64xf32, #tpu.memory_space<vmem>>, vector<1x10x8x64xf32>
    %c0_204 = arith.constant 0 : index
    %c0_205 = arith.constant 0 : index
    %c0_206 = arith.constant 0 : index
    %c128_207 = arith.constant 128 : index
    %104 = vector.load %arg7[%c0_204, %c0_205, %c0_206, %c128_207] : memref<1x10x8x192xf32, #tpu.memory_space<vmem>>, vector<1x10x8x64xf32>
    tpu.vector_store %arg7[%c0_204, %c0_205, %c0_206, %c128_207], %103 {strides = array<i32>} : memref<1x10x8x192xf32, #tpu.memory_space<vmem>>, vector<1x10x8x64xf32>,
    %cst_208 = arith.constant 0.000000e+00 : f32
    %105 = vector.broadcast %cst_208 : f32 to vector<64x1xf32>
    %c0_209 = arith.constant 0 : index
    %c0_210 = arith.constant 0 : index
    %c0_211 = arith.constant 0 : index
    %c0_212 = arith.constant 0 : index
    %106 = vector.load %arg7[%c0_209, %c0_210, %c0_211, %c0_212] : memref<1x10x8x192xf32, #tpu.memory_space<vmem>>, vector<1x8x8x192xf32>
    %107 = vector.shape_cast %106 : vector<1x8x8x192xf32> to vector<64x192xf32>
    %c0_213 = arith.constant 0 : index
    %c0_214 = arith.constant 0 : index
    %c0_215 = arith.constant 0 : index
    %108 = vector.load %arg3[%c0_213, %c0_214, %c0_215] : memref<3x1x192xf32, #tpu.memory_space<vmem>>, vector<1x1x192xf32>
    %109 = vector.shape_cast %108 : vector<1x1x192xf32> to vector<1x192xf32>
    %110 = vector.broadcast %109 : vector<1x192xf32> to vector<64x192xf32>
    %111 = arith.mulf %107, %110 : vector<64x192xf32>
    %cst_216 = arith.constant dense<0.000000e+00> : vector<64xf32>
    %112 = vector.multi_reduction <add>, %111, %cst_216 [1] : vector<64x192xf32> to vector<64xf32>
    %113 = vector.shape_cast %112 : vector<64xf32> to vector<64x1xf32>
    %114 = arith.addf %105, %113 : vector<64x1xf32>
    %c0_217 = arith.constant 0 : index
    %c1_218 = arith.constant 1 : index
    %c0_219 = arith.constant 0 : index
    %c0_220 = arith.constant 0 : index
    %115 = vector.load %arg7[%c0_217, %c1_218, %c0_219, %c0_220] : memref<1x10x8x192xf32, #tpu.memory_space<vmem>>, vector<1x8x8x192xf32>
    %116 = vector.shape_cast %115 : vector<1x8x8x192xf32> to vector<64x192xf32>
    %c1_221 = arith.constant 1 : index
    %c0_222 = arith.constant 0 : index
    %c0_223 = arith.constant 0 : index
    %117 = vector.load %arg3[%c1_221, %c0_222, %c0_223] : memref<3x1x192xf32, #tpu.memory_space<vmem>>, vector<1x1x192xf32>
    %118 = vector.shape_cast %117 : vector<1x1x192xf32> to vector<1x192xf32>
    %119 = vector.broadcast %118 : vector<1x192xf32> to vector<64x192xf32>
    %120 = arith.mulf %116, %119 : vector<64x192xf32>
    %cst_224 = arith.constant dense<0.000000e+00> : vector<64xf32>
    %121 = vector.multi_reduction <add>, %120, %cst_224 [1] : vector<64x192xf32> to vector<64xf32>
    %122 = vector.shape_cast %121 : vector<64xf32> to vector<64x1xf32>
    %123 = arith.addf %114, %122 : vector<64x1xf32>
    %c0_225 = arith.constant 0 : index
    %c2_226 = arith.constant 2 : index
    %c0_227 = arith.constant 0 : index
    %c0_228 = arith.constant 0 : index
    %124 = vector.load %arg7[%c0_225, %c2_226, %c0_227, %c0_228] : memref<1x10x8x192xf32, #tpu.memory_space<vmem>>, vector<1x8x8x192xf32>
    %125 = vector.shape_cast %124 : vector<1x8x8x192xf32> to vector<64x192xf32>
    %c2_229 = arith.constant 2 : index
    %c0_230 = arith.constant 0 : index
    %c0_231 = arith.constant 0 : index
    %126 = vector.load %arg3[%c2_229, %c0_230, %c0_231] : memref<3x1x192xf32, #tpu.memory_space<vmem>>, vector<1x1x192xf32>
    %127 = vector.shape_cast %126 : vector<1x1x192xf32> to vector<1x192xf32>
    %128 = vector.broadcast %127 : vector<1x192xf32> to vector<64x192xf32>
    %129 = arith.mulf %125, %128 : vector<64x192xf32>
    %cst_232 = arith.constant dense<0.000000e+00> : vector<64xf32>
    %130 = vector.multi_reduction <add>, %129, %cst_232 [1] : vector<64x192xf32> to vector<64xf32>
    %131 = vector.shape_cast %130 : vector<64xf32> to vector<64x1xf32>
    %132 = arith.addf %123, %131 : vector<64x1xf32>
    %133 = vector.shape_cast %132 : vector<64x1xf32> to vector<1x64x1xf32>
    %cst_233 = arith.constant dense<0.000000e+00> : vector<1x1xf32>
    %134 = vector.multi_reduction <add>, %133, %cst_233 [1] : vector<1x64x1xf32> to vector<1x1xf32>
    %c0_234 = arith.constant 0 : index
    %135 = memref.load %arg4[%c0_234] : memref<1xf32, #tpu.memory_space<smem>>
    %136 = vector.broadcast %135 : f32 to vector<1x1xf32>
    %137 = arith.addf %134, %136 : vector<1x1xf32>
    %cst_235 = arith.constant 0.000000e+00 : f32
    %138 = vector.broadcast %cst_235 : f32 to vector<1x1xf32>
    %139 = arith.subf %138, %137 : vector<1x1xf32>
    %140 = math.exp %139 : vector<1x1xf32>
    %cst_236 = arith.constant 1.000000e+00 : f32
    %141 = vector.broadcast %cst_236 : f32 to vector<1x1xf32>
    %142 = arith.addf %141, %140 : vector<1x1xf32>
    %cst_237 = arith.constant 1.000000e+00 : f32
    %143 = vector.broadcast %cst_237 : f32 to vector<1x1xf32>
    %144 = arith.divf %143, %142 : vector<1x1xf32>
    %145 = vector.shape_cast %144 : vector<1x1xf32> to vector<1x1x1xf32>
    %c0_238 = arith.constant 0 : index
    %c0_239 = arith.constant 0 : index
    %c0_240 = arith.constant 0 : index
    %146 = vector.load %arg5[%c0_238, %c0_239, %c0_240] : memref<1x1x1xf32, #tpu.memory_space<vmem>>, vector<1x1x1xf32>
    tpu.vector_store %arg5[%c0_238, %c0_239, %c0_240], %145 {strides = array<i32>} : memref<1x1x1xf32, #tpu.memory_space<vmem>>, vector<1x1x1xf32>,
    return
  }
  func.func @transform_0(%arg0: i32) -> (i32, i32, i32, i32) {
    %c0_i32 = arith.constant 0 : i32
    %c0_i32_0 = arith.constant 0 : i32
    %c0_i32_1 = arith.constant 0 : i32
    %c0_i32_2 = arith.constant 0 : i32
    return %arg0, %c0_i32, %c0_i32_0, %c0_i32_1 : i32, i32, i32, i32
  }
  func.func @transform_1(%arg0: i32) -> (i32, i32, i32, i32) {
    %c0_i32 = arith.constant 0 : i32
    %c0_i32_0 = arith.constant 0 : i32
    %c0_i32_1 = arith.constant 0 : i32
    %c0_i32_2 = arith.constant 0 : i32
    %c0_i32_3 = arith.constant 0 : i32
    return %c0_i32, %c0_i32_0, %c0_i32_1, %c0_i32_2 : i32, i32, i32, i32
  }
  func.func @transform_2(%arg0: i32) -> (i32, i32, i32) {
    %c0_i32 = arith.constant 0 : i32
    %c0_i32_0 = arith.constant 0 : i32
    %c0_i32_1 = arith.constant 0 : i32
    %c0_i32_2 = arith.constant 0 : i32
    return %c0_i32, %c0_i32_0, %c0_i32_1 : i32, i32, i32
  }
  func.func @transform_3(%arg0: i32) -> i32 {
    %c0_i32 = arith.constant 0 : i32
    %c0_i32_0 = arith.constant 0 : i32
    return %c0_i32 : i32
  }
  func.func @transform_4(%arg0: i32) -> (i32, i32, i32) {
    %c0_i32 = arith.constant 0 : i32
    %c0_i32_0 = arith.constant 0 : i32
    %c0_i32_1 = arith.constant 0 : i32
    return %arg0, %c0_i32, %c0_i32_0 : i32, i32, i32
  }
}

</mosaic_0001>

<bundles_post_ra>
// kernel: tpu_custom_call.1
= control target key start
LH: loop header
LB: loop body
LE: loop exit
PB: predicated region body
PF: predicated region fallthrough
CT: control target
= control target key end

     0   :  { %s3441_s17 = smov 0   ;;  %s4530_s0 = inlined_call_operand.vmem [shape: bf16[2,8,8,64], index: 0, kind: input, shape index: {}]   ;;  %s4531_s1 = inlined_call_operand.vmem [shape: bf16[3,3,192,64], index: 1, kind: input, shape index: {}]   ;;  %s4532_s2 = inlined_call_operand.vmem [shape: f32[3,1,192], index: 2, kind: input, shape index: {}]   ;;  %s4533_s3 = inlined_call_operand.<no memory space> [shape: f32[1], index: 3, kind: input, shape index: {}]   ;;  %s4534_s4 = inlined_call_operand.vmem [shape: f32[2,1,1], index: 4, kind: output, shape index: {}]  }
   0x1   :  { %9 = sst [smem:[#allocation4]] %s4533_s3 }
   0x2 LB: > { %s2803_s18 = sadd.s32 4294967295, %s3408_s17   ;;  %p2807_p0 = scmp.ge.s32.totalorder %s3408_s17, 1  ;;  %s3408_s17 = sphi %s3441_s17, %s15_s17  }
   0x3   : > { %p163_p1 = scmp.lt.s32.totalorder %s3408_s17, 3 }
   0x5   : > { %p164_p2 = pnand %p2807_p0, %p163_p1 }
   0x6   : > { %vm217_vm0 = vcmask (!%p164_p2), 523264   ;;  %p187_p3 = scmp.lt.s32.totalorder (!%p164_p2), %s2803_s18, 1  ;;  %v3289_v0 = vld [vmem:[%s4531_s1] sm:$0xff] (!%p164_p2)   ;;  %v3410_v1 = vmov (!%p164_p2), 0.0   ;;  %v3411_v2 = vmov (!%p164_p2), 0   ;;  %v3291_v4 = vld [vmem:[%s4531_s1 + $0x8] sm:$0xff] (!%p164_p2)  }
   0x7   : > { %167 = sbr.rel (%p164_p2) target bundleno = 1684 (0x694), region = 36  ;;  %218 = vst.msk [vmem:[#allocation2 + $0x8] sm:$0xff] (!%p164_p2), %vm217_vm0, %v3410_v1  ;;  %220 = vst.msk [vmem:[#allocation2 + $0xe0] sm:$0xff] (!%p164_p2), %vm217_vm0, %v3410_v1  ;;  %678 = vmatprep.subr.bf16.mxu0 (!%p164_p2), %v3411_v2  ;;  %529 = vmatprep.subr.bf16.mxu1 (!%p164_p2), %v3411_v2  ;;  %v3290_v3 = vld [vmem:[%s4531_s1 + $0x60] sm:$0xff] (!%p164_p2)   ;;  %v3292_v5 = vld [vmem:[%s4531_s1 + $0x68] sm:$0xff] (!%p164_p2)   ;;  %vm196_vm1 = vcmask (!%p164_p2), 516096  }
   0x8   : > { %679 = vmatpush1.bf16.msra.mxu0 (!%p164_p2), %v3289_v0  ;;  %530 = vmatpush1.bf16.msra.mxu1 (!%p164_p2), %v3290_v3  ;;  %v3293_v6 = vld [vmem:[%s4531_s1 + $0x10] sm:$0xff] (!%p164_p2)   ;;  %197 = vst.msk [vmem:[#allocation2 + $0x7] sm:$0x1] (!%p164_p2), %vm196_vm1, %v3410_v1  ;;  %198 = vst.msk [vmem:[#allocation2 + $0x1f] sm:$0x1] (!%p164_p2), %vm196_vm1, %v3410_v1  ;;  %s3412_s8 = smov (!%p164_p2), 64  }
   0x9   : > { %680 = vmatprep.subr.bf16.mxu0 (!%p164_p2), %v3411_v2  ;;  %531 = vmatprep.subr.bf16.mxu1 (!%p164_p2), %v3411_v2  ;;  %199 = vst.msk [vmem:[#allocation2 + $0x37] sm:$0x1] (!%p164_p2), %vm196_vm1, %v3410_v1  ;;  %200 = vst.msk [vmem:[#allocation2 + $0x4f] sm:$0x1] (!%p164_p2), %vm196_vm1, %v3410_v1  ;;  %v3294_v20 = vld [vmem:[%s4531_s1 + $0x70] sm:$0xff] (!%p164_p2)   ;;  %v3295_v21 = vld [vmem:[%s4531_s1 + $0x18] sm:$0xff] (!%p164_p2)  }
   0xa   : > { %201 = vst.msk [vmem:[#allocation2 + $0x67] sm:$0x1] (!%p164_p2), %vm196_vm1, %v3410_v1  ;;  %202 = vst.msk [vmem:[#allocation2 + $0x7f] sm:$0x1] (!%p164_p2), %vm196_vm1, %v3410_v1  ;;  %v3296_v22 = vld [vmem:[%s4531_s1 + $0x78] sm:$0xff] (!%p164_p2)   ;;  %v3297_v23 = vld [vmem:[%s4531_s1 + $0x20] sm:$0xff] (!%p164_p2)  }
   0xb   : > { %203 = vst.msk [vmem:[#allocation2 + $0x97] sm:$0x1] (!%p164_p2), %vm196_vm1, %v3410_v1  ;;  %204 = vst.msk [vmem:[#allocation2 + $0xaf] sm:$0x1] (!%p164_p2), %vm196_vm1, %v3410_v1  ;;  %v3298_v26 = vld [vmem:[%s4531_s1 + $0x80] sm:$0xff] (!%p164_p2)   ;;  %v3299_v27 = vld [vmem:[%s4531_s1 + $0x28] sm:$0xff] (!%p164_p2)  }
   0xc   : > { %681 = vmatpush1.bf16.msra.mxu0 (!%p164_p2), %v3291_v4  ;;  %205 = vst.msk [vmem:[#allocation2 + $0xc7] sm:$0x1] (!%p164_p2), %vm196_vm1, %v3410_v1  ;;  %206 = vst.msk [vmem:[#allocation2 + $0xdf] sm:$0x1] (!%p164_p2), %vm196_vm1, %v3410_v1  ;;  %532 = vmatpush1.bf16.msra.mxu1 (!%p164_p2), %v3292_v5  ;;  %v3300_v30 = vld [vmem:[%s4531_s1 + $0x88] sm:$0xff] (!%p164_p2)   ;;  %v3301_v31 = vld [vmem:[%s4531_s1 + $0x30] sm:$0xff] (!%p164_p2)  }
   0xd   : > { %207 = vst.msk [vmem:[#allocation2 + $0x10] sm:$0x1] (!%p164_p2), %vm196_vm1, %v3410_v1  ;;  %208 = vst.msk [vmem:[#allocation2 + $0x28] sm:$0x1] (!%p164_p2), %vm196_vm1, %v3410_v1  ;;  %682 = vmatprep.subr.bf16.mxu0 (!%p164_p2), %v3411_v2  ;;  %533 = vmatprep.subr.bf16.mxu1 (!%p164_p2), %v3411_v2  ;;  %v3302_v37 = vld [vmem:[%s4531_s1 + $0x90] sm:$0xff] (!%p164_p2)   ;;  %v3303_v38 = vld [vmem:[%s4531_s1 + $0x38] sm:$0xff] (!%p164_p2)  }
   0xe   : > { %s4536_s18 = smov (!%p187_p3, %s2803_s18), 1  ;;  %209 = vst.msk [vmem:[#allocation2 + $0x40] sm:$0x1] %vm196_vm1, %v3410_v1  ;;  %210 = vst.msk [vmem:[#allocation2 + $0x58] sm:$0x1] %vm196_vm1, %v3410_v1  ;;  %v266_v15 = vld [vmem:[#allocation2 + $0x8] sm:$0xff] }
   0xf   : > { %s3150_s24 = sshll.u32 %s4536_s18, 5  ;;  %211 = vst.msk [vmem:[#allocation2 + $0x70] sm:$0x1] %vm196_vm1, %v3410_v1  ;;  %212 = vst.msk [vmem:[#allocation2 + $0x88] sm:$0x1] %vm196_vm1, %v3410_v1  ;;  %286 = vrot.lane.b32.xlu0 %v266_v15, %s3412_s8  ;;  %v3546_v33 = vld [vmem:[#allocation2 + $0x7] sm:$0xff]  ;;  %s194_s30 = scalar_lea.vmem %s4534_s4, %s4536_s18 }
  0x10   : > { %s3472_s29 = scalar_lea.vmem %s4530_s0, %s3150_s24  ;;  %213 = vst.msk [vmem:[#allocation2 + $0xa0] sm:$0x1] %vm196_vm1, %v3410_v1  ;;  %214 = vst.msk [vmem:[#allocation2 + $0xb8] sm:$0x1] %vm196_vm1, %v3410_v1  ;;  %683 = vmatpush1.bf16.msra.mxu0 %v3293_v6  ;;  %534 = vmatpush1.bf16.msra.mxu1 %v3294_v20  ;;  %v3304_v41 = vld [vmem:[%s4531_s1 + $0x98] sm:$0xff]   ;;  %v3569_v42 = vld [vmem:[#allocation2 + $0xe0] sm:$0xff] }
  0x11   : > { %v3152_v7 = vld [vmem:[%s3472_s29] sm:$0xff]   ;;  %v3167_v8 = vld [vmem:[%s3472_s29 + $0x8] sm:$0xff]   ;;  %v3168_v9 = vld [vmem:[%s3472_s29 + $0x10] sm:$0xff]   ;;  %215 = vst.msk [vmem:[#allocation2 + $0xd0] sm:$0x1] %vm196_vm1, %v3410_v1  ;;  %684 = vmatprep.subr.bf16.mxu0 %v3411_v2  ;;  %535 = vmatprep.subr.bf16.mxu1 %v3411_v2  ;;  %vm316_vm2 = vcmask 1048064  }
  0x12   : > { %216 = vst.msk [vmem:[#allocation2 + $0xe8] sm:$0x1] %vm196_vm1, %v3410_v1  ;;  %v3154_v10 = vunpack.c.h.bf16 %v3152_v7  ;;  %v3153_v11 = vunpack.c.l.bf16 %v3152_v7  ;;  %v3157_v12 = vunpack.c.l.bf16 %v3167_v8  ;;  %v3158_v13 = vunpack.c.h.bf16 %v3167_v8  ;;  %v3169_v14 = vld [vmem:[%s3472_s29 + $0x18] sm:$0xff]   ;;  %v3305_v44 = vld [vmem:[%s4531_s1 + $0x40] sm:$0xff]   ;;  %v3307_v49 = vld [vmem:[%s4531_s1 + $0x48] sm:$0xff]   ;;  %s2745_s27 = sld [smem:[#allocation4]] }
  0x13   : > { %v3161_v16 = vunpack.c.l.bf16 %v3168_v9  ;;  %v3162_v17 = vunpack.c.h.bf16 %v3168_v9  ;;  %v3165_v18 = vunpack.c.l.bf16 %v3169_v14  ;;  %v3166_v19 = vunpack.c.h.bf16 %v3169_v14  ;;  %256 = vst.msk [vmem:[#allocation3] sm:$0xff] %vm217_vm0, %v3546_v33  ;;  %v3306_v47 = vld [vmem:[%s4531_s1 + $0xa0] sm:$0xff]   ;;  %v3308_v51 = vld [vmem:[%s4531_s1 + $0xa8] sm:$0xff]   ;;  %v3309_v52 = vld [vmem:[%s4531_s1 + $0x50] sm:$0xff]  }
  0x14   : > { %239 = vst.msk [vmem:[#allocation2 + $0x38] sm:$0xff] %vm217_vm0, %v3154_v10  ;;  %238 = vst.msk [vmem:[#allocation2 + $0x20] sm:$0xff] %vm217_vm0, %v3153_v11  ;;  %685 = vmatpush1.bf16.msra.mxu0 %v3295_v21  ;;  %536 = vmatpush1.bf16.msra.mxu1 %v3296_v22  ;;  %v3578_v46 = vld [vmem:[#allocation2 + $0x9] sm:$0xff]  ;;  %v3311_v63 = vld [vmem:[%s4531_s1 + $0x58] sm:$0xff]   ;;  %vm2754_vm3 = vcmask 0  }
  0x15   : > { %240 = vst.msk [vmem:[#allocation2 + $0x50] sm:$0xff] %vm217_vm0, %v3157_v12  ;;  %241 = vst.msk [vmem:[#allocation2 + $0x68] sm:$0xff] %vm217_vm0, %v3158_v13  ;;  %686 = vmatprep.subr.bf16.mxu0 %v3411_v2  ;;  %537 = vmatprep.subr.bf16.mxu1 %v3411_v2  ;;  %v3310_v61 = vld [vmem:[%s4531_s1 + $0xb0] sm:$0xff]   ;;  %v3312_v5 = vld [vmem:[%s4531_s1 + $0xb8] sm:$0xff]  }
  0x16   : > { %242 = vst.msk [vmem:[#allocation2 + $0x80] sm:$0xff] %vm217_vm0, %v3161_v16  ;;  %243 = vst.msk [vmem:[#allocation2 + $0x98] sm:$0xff] %vm217_vm0, %v3162_v17  ;;  %v3633_v8 = vld [vmem:[#allocation2 + $0xdf] sm:$0xff] }
  0x17   : > { %244 = vst.msk [vmem:[#allocation2 + $0xb0] sm:$0xff] %vm217_vm0, %v3165_v18  ;;  %245 = vst.msk [vmem:[#allocation2 + $0xc8] sm:$0xff] %vm217_vm0, %v3166_v19  ;;  %v3313_v21 = vld [vmem:[%s4531_s1 + $0xc0] sm:$0xff]  }
  0x18   : > { %687 = vmatpush1.bf16.msra.mxu0 %v3297_v23  ;;  %538 = vmatpush1.bf16.msra.mxu1 %v3298_v26  ;;  %337 = vst.msk [vmem:[#allocation3 + $0x8] sm:$0xff] %vm217_vm0, %v3578_v46  ;;  %265 = vst.msk [vmem:[#allocation3 + $0x90] sm:$0xff] %vm217_vm0, %v3633_v8 }
  0x19   : > { %688 = vmatprep.subr.bf16.mxu0 %v3411_v2  ;;  %539 = vmatprep.subr.bf16.mxu1 %v3411_v2  ;;  %v3637_v9 = vld [vmem:[#allocation2 + $0xe1] sm:$0xff] }
  0x1a   : > { %346 = vst.msk [vmem:[#allocation3 + $0x98] sm:$0xff] %vm217_vm0, %v3637_v9 }
  0x1b   : > { %v268_v24 = vld [vmem:[#allocation2 + $0x38] sm:$0xff]  ;;  %v267_v25 = vld [vmem:[#allocation2 + $0x20] sm:$0xff] }
  0x1c   : > { %290 = vrot.lane.b32.xlu1 %v268_v24, %s3412_s8  ;;  %288 = vrot.lane.b32.xlu0 %v267_v25, %s3412_s8  ;;  %v269_v28 = vld [vmem:[#allocation2 + $0x50] sm:$0xff]  ;;  %v270_v29 = vld [vmem:[#allocation2 + $0x68] sm:$0xff]  ;;  %v247_v40 = vld [vmem:[#allocation2 + $0x1f] sm:$0xff] }
  0x1d   : > { %v271_v32 = vld [vmem:[#allocation2 + $0x80] sm:$0xff]  ;;  %v272_v34 = vld [vmem:[#allocation2 + $0x98] sm:$0xff]  ;;  %689 = vmatpush1.bf16.msra.mxu0 %v3299_v27  ;;  %540 = vmatpush1.bf16.msra.mxu1 %v3300_v30  ;;  %257 = vst.msk [vmem:[#allocation3 + $0x10] sm:$0xff] %vm217_vm0, %v247_v40  ;;  %v249_v48 = vld [vmem:[#allocation2 + $0x4f] sm:$0xff] }
  0x1e   : > { %690 = vmatprep.subr.bf16.mxu0 %v3411_v2  ;;  %v273_v35 = vld [vmem:[#allocation2 + $0xb0] sm:$0xff]  ;;  %v274_v36 = vld [vmem:[#allocation2 + $0xc8] sm:$0xff]  ;;  %541 = vmatprep.subr.bf16.mxu1 %v3411_v2  ;;  %v329_v45 = vld [vmem:[#allocation2 + $0x39] sm:$0xff]  ;;  %259 = vst.msk [vmem:[#allocation3 + $0x30] sm:$0xff] %vm217_vm0, %v249_v48 }
  0x1f   : > { %v248_v39 = vld [vmem:[#allocation2 + $0x37] sm:$0xff]  ;;  %v328_v43 = vld [vmem:[#allocation2 + $0x21] sm:$0xff]  ;;  %339 = vst.msk [vmem:[#allocation3 + $0x28] sm:$0xff] %vm217_vm0, %v329_v45  ;;  %v331_v58 = vld [vmem:[#allocation2 + $0x69] sm:$0xff] }
  0x20   : > { %292 = vrot.lane.b32.xlu1 %v269_v28, %s3412_s8  ;;  %294 = vrot.lane.b32.xlu0 %v270_v29, %s3412_s8  ;;  %258 = vst.msk [vmem:[#allocation3 + $0x20] sm:$0xff] %vm217_vm0, %v248_v39  ;;  %338 = vst.msk [vmem:[#allocation3 + $0x18] sm:$0xff] %vm217_vm0, %v328_v43  ;;  %v250_v50 = vld [vmem:[#allocation2 + $0x67] sm:$0xff]  ;;  %v251_v54 = vld [vmem:[#allocation2 + $0x7f] sm:$0xff] }
  0x21   : > { %691 = vmatpush1.bf16.msra.mxu0 %v3301_v31  ;;  %542 = vmatpush1.bf16.msra.mxu1 %v3302_v37  ;;  %260 = vst.msk [vmem:[#allocation3 + $0x40] sm:$0xff] %vm217_vm0, %v250_v50  ;;  %v252_v55 = vld [vmem:[#allocation2 + $0x97] sm:$0xff]  ;;  %261 = vst.msk [vmem:[#allocation3 + $0x50] sm:$0xff] %vm217_vm0, %v251_v54  ;;  %v253_v0 = vld [vmem:[#allocation2 + $0xaf] sm:$0xff] }
  0x22   : > { %692 = vmatprep.subr.bf16.mxu0 %v3411_v2  ;;  %543 = vmatprep.subr.bf16.mxu1 %v3411_v2  ;;  %262 = vst.msk [vmem:[#allocation3 + $0x60] sm:$0xff] %vm217_vm0, %v252_v55  ;;  %v330_v57 = vld [vmem:[#allocation2 + $0x51] sm:$0xff]  ;;  %341 = vst.msk [vmem:[#allocation3 + $0x48] sm:$0xff] %vm217_vm0, %v331_v58  ;;  %v254_v1 = vld [vmem:[#allocation2 + $0xc7] sm:$0xff] }
  0x23   : > { %v348_v60 = vld [vmem:[#allocation3 + $0x8] sm:$0xff]  ;;  %340 = vst.msk [vmem:[#allocation3 + $0x38] sm:$0xff] %vm217_vm0, %v330_v57  ;;  %263 = vst.msk [vmem:[#allocation3 + $0x70] sm:$0xff] %vm217_vm0, %v253_v0  ;;  %v332_v3 = vld [vmem:[#allocation2 + $0x81] sm:$0xff] }
  0x24   : > { %296 = vrot.lane.b32.xlu1 %v271_v32, %s3412_s8  ;;  %298 = vrot.lane.b32.xlu0 %v272_v34, %s3412_s8  ;;  %1048 = vst.msk [vmem:[#allocation3 + $0x8] sm:$0xff] %vm217_vm0, %v3578_v46  ;;  %264 = vst.msk [vmem:[#allocation3 + $0x80] sm:$0xff] %vm217_vm0, %v254_v1  ;;  %v333_v4 = vld [vmem:[#allocation2 + $0x99] sm:$0xff]  ;;  %v334_v6 = vld [vmem:[#allocation2 + $0xb1] sm:$0xff] }
  0x25   : > { %693 = vmatpush1.bf16.msra.mxu0 %v3303_v38  ;;  %544 = vmatpush1.bf16.msra.mxu1 %v3304_v41  ;;  %342 = vst.msk [vmem:[#allocation3 + $0x58] sm:$0xff] %vm217_vm0, %v332_v3  ;;  %343 = vst.msk [vmem:[#allocation3 + $0x68] sm:$0xff] %vm217_vm0, %v333_v4  ;;  %v335_v7 = vld [vmem:[#allocation2 + $0xc9] sm:$0xff]  ;;  %v3316_v41 = vld [vmem:[%s4531_s1 + $0xd8] sm:$0xff]  }
  0x26   : > { %694 = vmatprep.subr.bf16.mxu0 %v3411_v2  ;;  %545 = vmatprep.subr.bf16.mxu1 %v3411_v2  ;;  %v3601_v56 = vld [vmem:[#allocation3 + $0x28] sm:$0xff]  ;;  %344 = vst.msk [vmem:[#allocation3 + $0x78] sm:$0xff] %vm217_vm0, %v334_v6  ;;  %345 = vst.msk [vmem:[#allocation3 + $0x88] sm:$0xff] %vm217_vm0, %v335_v7  ;;  %v3641_v10 = vld [vmem:[#allocation3 + $0x98] sm:$0xff] }
  0x27   : > { %v397_v53 = vld [vmem:[#allocation3 + $0x18] sm:$0xff]  ;;  %1057 = vst.msk [vmem:[#allocation3 + $0x98] sm:$0xff] %vm217_vm0, %v3637_v9  ;;  %v3315_v37 = vld [vmem:[%s4531_s1 + $0xd0] sm:$0xff]   ;;  %v3317_v50 = vld [vmem:[%s4531_s1 + $0xe0] sm:$0xff]  }
  0x28   : > { %300 = vrot.lane.b32.xlu1 %v273_v35, %s3412_s8  ;;  %302 = vrot.lane.b32.xlu0 %v274_v36, %s3412_s8  ;;  %v413_v59 = vpack.c.bf16 %v3601_v56, %v397_v53  ;;  %v364_v62 = vpack.c.bf16 %v397_v53, %v348_v60  ;;  %v3314_v28 = vld [vmem:[%s4531_s1 + $0xc8] sm:$0xff]   ;;  %v3320_v60 = vld [vmem:[%s4531_s1 + $0xf8] sm:$0xff]  }
  0x29   : > { %695 = vmatpush1.bf16.msra.mxu0 %v3305_v44  ;;  %546 = vmatpush1.bf16.msra.mxu1 %v3306_v47  ;;  %v403_v18 = vld [vmem:[#allocation3 + $0x48] sm:$0xff]  ;;  %v3318_v54 = vld [vmem:[%s4531_s1 + $0xe8] sm:$0xff]  }
  0x2a   : > { %696 = vmatprep.subr.bf16.mxu0 %v3411_v2  ;;  %547 = vmatprep.subr.bf16.mxu1 %v3411_v2  ;;  %v354_v17 = vld [vmem:[#allocation3 + $0x38] sm:$0xff]  ;;  %v3324_v0 = vld [vmem:[%s4531_s1 + $0x118] sm:$0xff]  }
  0x2b   : > { %2846 = vmatprep.mubr.msk.bf16.mxu1 %vm217_vm0, %v413_v59  ;;  %2862 = vmatprep.mubr.msk.bf16.mxu0 %vm217_vm0, %v364_v62  ;;  %v3656_v24 = vpack.c.bf16 %v354_v17, %v3601_v56  ;;  %v415_v27 = vpack.c.bf16 %v403_v18, %v354_v17  ;;  %v3319_v59 = vld [vmem:[%s4531_s1 + $0xf0] sm:$0xff]   ;;  %v3322_v62 = vld [vmem:[%s4531_s1 + $0x108] sm:$0xff]   ;;  %v3723_v4 = vld [vmem:[#allocation3 + $0x8] sm:$0xff] }
  0x2c   : > { %304 = vrot.lane.b32.xlu1 %v3569_v42, %s3412_s8  ;;  %v407_v34 = vld [vmem:[#allocation3 + $0x68] sm:$0xff]  ;;  %1758 = vst.msk [vmem:[#allocation3 + $0x8] sm:$0xff] %vm217_vm0, %v3578_v46  ;;  %v3326_v6 = vld [vmem:[%s4531_s1 + $0x188] sm:$0xff]   ;;  %v3327_v46 = vld [vmem:[%s4531_s1 + $0x190] sm:$0xff]  }
  0x2d   : > { %697 = vmatpush1.bf16.msra.mxu0 %v3307_v49  ;;  %548 = vmatpush1.bf16.msra.mxu1 %v3308_v51  ;;  %v409_v45 = vld [vmem:[#allocation3 + $0x78] sm:$0xff]  ;;  %v411_v47 = vld [vmem:[#allocation3 + $0x88] sm:$0xff] }
  0x2e   : > { %698 = vmatprep.subr.bf16.mxu0 %v3411_v2  ;;  %549 = vmatprep.subr.bf16.mxu1 %v3411_v2  ;;  %v419_v51 = vpack.c.bf16 %v411_v47, %v409_v45  ;;  %v370_v53 = vpack.c.bf16 %v409_v45, %v407_v34  ;;  %v767_v1 = vpack.c.bf16 %v3641_v10, %v411_v47  ;;  %v3734_v7 = vld [vmem:[#allocation3 + $0x98] sm:$0xff]  ;;  %v3329_v10 = vld [vmem:[%s4531_s1 + $0x1a0] sm:$0xff]  }
  0x2f   : > { %1767 = vst.msk [vmem:[#allocation3 + $0x98] sm:$0xff] %vm217_vm0, %v3637_v9  ;;  %v3330_v9 = vld [vmem:[%s4531_s1 + $0x1a8] sm:$0xff]  }
  0x31   : > { %699 = vmatpush1.bf16.msra.mxu0 %v3309_v52  ;;  %550 = vmatpush1.bf16.msra.mxu1 %v3310_v61  ;;  %v3321_v61 = vld [vmem:[%s4531_s1 + $0x100] sm:$0xff]  }
  0x32   : > { %700 = vmatprep.subr.bf16.mxu0 %v3411_v2  ;;  %551 = vmatprep.subr.bf16.mxu1 %v3411_v2 }
  0x35   : > { %701 = vmatpush1.bf16.msra.mxu0 %v3311_v63  ;;  %552 = vmatpush1.bf16.msra.mxu1 %v3312_v5  ;;  %v3323_v63 = vld [vmem:[%s4531_s1 + $0x110] sm:$0xff]   ;;  %v3325_v5 = vld [vmem:[%s4531_s1 + $0x180] sm:$0xff]  }
  0x36   : > { %877 = vmatprep.subr.bf16.mxu0 %v3411_v2  ;;  %1240 = vmatprep.subr.bf16.mxu1 %v3411_v2 }
  0x81   : > { %v287_v11 = vpop.permute.xlu0 %286 }
  0x82   : > { %317 = vst.msk [vmem:[#allocation3] sm:$0xff] %vm316_vm2, %v287_v11  ;;  %v3331_v11 = vld [vmem:[%s4531_s1 + $0x1b0] sm:$0xff]  }
  0x89   : > { %v347_v14 = vld [vmem:[#allocation3] sm:$0xff] }
  0x8a   : > { %968 = vst.msk [vmem:[#allocation3] sm:$0xff] %vm217_vm0, %v3546_v33  ;;  %v405_v33 = vld [vmem:[#allocation3 + $0x58] sm:$0xff] }
  0x8b   : > { %v417_v38 = vpack.c.bf16 %v407_v34, %v405_v33  ;;  %v368_v40 = vpack.c.bf16 %v405_v33, %v403_v18 }
  0x8e   : > { %v291_v12 = vpop.permute.xlu1 %290  ;;  %v289_v13 = vpop.permute.xlu0 %288 }
  0x8f   : > { %319 = vst.msk [vmem:[#allocation3 + $0x20] sm:$0xff] %vm316_vm2, %v291_v12  ;;  %318 = vst.msk [vmem:[#allocation3 + $0x10] sm:$0xff] %vm316_vm2, %v289_v13  ;;  %v3332_v12 = vld [vmem:[%s4531_s1 + $0x1b8] sm:$0xff]   ;;  %v3333_v13 = vld [vmem:[%s4531_s1 + $0x1c0] sm:$0xff]  }
  0x92   : > { %v293_v15 = vpop.permute.xlu1 %292  ;;  %v295_v16 = vpop.permute.xlu0 %294 }
  0x93   : > { %320 = vst.msk [vmem:[#allocation3 + $0x30] sm:$0xff] %vm316_vm2, %v293_v15  ;;  %321 = vst.msk [vmem:[#allocation3 + $0x40] sm:$0xff] %vm316_vm2, %v295_v16 }
  0x96   : > { %v396_v19 = vld [vmem:[#allocation3 + $0x10] sm:$0xff]  ;;  %v398_v20 = vld [vmem:[#allocation3 + $0x20] sm:$0xff]  ;;  %v297_v22 = vpop.permute.xlu1 %296  ;;  %v299_v23 = vpop.permute.xlu0 %298 }
  0x97   : > { %v412_v25 = vpack.c.bf16 %v398_v20, %v396_v19  ;;  %v363_v26 = vpack.c.bf16 %v396_v19, %v347_v14  ;;  %322 = vst.msk [vmem:[#allocation3 + $0x50] sm:$0xff] %vm316_vm2, %v297_v22  ;;  %323 = vst.msk [vmem:[#allocation3 + $0x60] sm:$0xff] %vm316_vm2, %v299_v23 }
  0x99   : > { %562 = vmatmul.mubr.bf16.vlgmr.msra.gmra.mrb[0].mxu1 %v412_v25  ;;  %711 = vmatmul.mubr.bf16.vlgmr.msra.gmra.mrb[0].mxu0 %v363_v26 }
  0x9a   : > { %878 = vmatpush1.bf16.msra.mxu0 %v3313_v21  ;;  %2863 = vmatprep.mubr.msk.bf16.mxu0 %vm217_vm0, %v3656_v24  ;;  %v353_v29 = vld [vmem:[#allocation3 + $0x30] sm:$0xff]  ;;  %v402_v30 = vld [vmem:[#allocation3 + $0x40] sm:$0xff]  ;;  %v301_v31 = vpop.permute.xlu1 %300  ;;  %v303_v32 = vpop.permute.xlu0 %302 }
  0x9b   : > { %879 = vmatprep.subr.bf16.mxu0 %v3411_v2  ;;  %2847 = vmatprep.mubr.msk.bf16.mxu1 %vm217_vm0, %v415_v27  ;;  %324 = vst.msk [vmem:[#allocation3 + $0x70] sm:$0xff] %vm316_vm2, %v301_v31  ;;  %325 = vst.msk [vmem:[#allocation3 + $0x80] sm:$0xff] %vm316_vm2, %v303_v32  ;;  %v365_v35 = vpack.c.bf16 %v353_v29, %v398_v20  ;;  %v414_v36 = vpack.c.bf16 %v402_v30, %v353_v29  ;;  %v3335_v32 = vld [vmem:[%s4531_s1 + $0x1d0] sm:$0xff]  }
  0x9c   : > { %1241 = vmatpush1.bf16.msra.mxu1 %v3325_v5 }
  0x9d   : > { %1242 = vmatprep.subr.bf16.mxu1 %v3411_v2 }
  0x9e   : > { %880 = vmatpush1.bf16.msra.mxu0 %v3314_v28  ;;  %v305_v39 = vpop.permute.xlu1 %304  ;;  %v404_v43 = vld [vmem:[#allocation3 + $0x50] sm:$0xff]  ;;  %v406_v44 = vld [vmem:[#allocation3 + $0x60] sm:$0xff] }
  0x9f   : > { %881 = vmatprep.subr.bf16.mxu0 %v3411_v2  ;;  %326 = vst.msk [vmem:[#allocation3 + $0x90] sm:$0xff] %vm316_vm2, %v305_v39  ;;  %v416_v48 = vpack.c.bf16 %v406_v44, %v404_v43  ;;  %v367_v49 = vpack.c.bf16 %v404_v43, %v402_v30  ;;  %v3334_v30 = vld [vmem:[%s4531_s1 + $0x1c8] sm:$0xff]  }
  0xa0   : > { %1243 = vmatpush1.bf16.msra.mxu1 %v3326_v6 }
  0xa1   : > { %719 = vmatmul.mubr.bf16.gmra.mrb[4].mxu0 %v365_v35  ;;  %570 = vmatmul.mubr.bf16.gmra.mrb[4].mxu1 %v414_v36 }
  0xa2   : > { %882 = vmatpush1.bf16.msra.mxu0 %v3315_v37  ;;  %2848 = vmatprep.mubr.msk.bf16.mxu1 %vm217_vm0, %v417_v38  ;;  %v408_v55 = vld [vmem:[#allocation3 + $0x70] sm:$0xff]  ;;  %v410_v56 = vld [vmem:[#allocation3 + $0x80] sm:$0xff]  ;;  %v3336_v38 = vld [vmem:[%s4531_s1 + $0x1d8] sm:$0xff]  }
  0xa3   : > { %883 = vmatprep.subr.bf16.mxu0 %v3411_v2  ;;  %2864 = vmatprep.mubr.msk.bf16.mxu0 %vm217_vm0, %v368_v40  ;;  %v418_v57 = vpack.c.bf16 %v410_v56, %v408_v55  ;;  %v369_v58 = vpack.c.bf16 %v408_v55, %v406_v44 }
  0xa4   : > { %1244 = vmatprep.subr.bf16.mxu1 %v3411_v2 }
  0xa5   : > { %1245 = vmatpush1.bf16.msra.mxu1 %v3327_v46 }
  0xa6   : > { %884 = vmatpush1.bf16.msra.mxu0 %v3316_v41  ;;  %v758_v52 = vld [vmem:[#allocation3 + $0x90] sm:$0xff]  ;;  %1246 = vmatprep.subr.bf16.mxu1 %v3411_v2 }
  0xa7   : > { %885 = vmatprep.subr.bf16.mxu0 %v3411_v2  ;;  %977 = vst.msk [vmem:[#allocation3 + $0x90] sm:$0xff] %vm217_vm0, %v3633_v8  ;;  %v766_v3 = vpack.c.bf16 %v758_v52, %v410_v56  ;;  %v3328_v8 = vld [vmem:[%s4531_s1 + $0x198] sm:$0xff]  }
  0xa9   : > { %578 = vmatmul.mubr.bf16.gmra.mrb[8].mxu1 %v416_v48  ;;  %727 = vmatmul.mubr.bf16.gmra.mrb[8].mxu0 %v367_v49 }
  0xaa   : > { %886 = vmatpush1.bf16.msra.mxu0 %v3317_v50  ;;  %2849 = vmatprep.mubr.msk.bf16.mxu1 %vm217_vm0, %v419_v51 }
  0xab   : > { %887 = vmatprep.subr.bf16.mxu0 %v3411_v2  ;;  %2865 = vmatprep.mubr.msk.bf16.mxu0 %vm217_vm0, %v370_v53 }
  0xac   : > { %1247 = vmatpush1.bf16.msra.mxu1 %v3328_v8 }
  0xad   : > { %1248 = vmatprep.subr.bf16.mxu1 %v3411_v2 }
  0xae   : > { %888 = vmatpush1.bf16.msra.mxu0 %v3318_v54 }
  0xaf   : > { %889 = vmatprep.subr.bf16.mxu0 %v3411_v2 }
  0xb0   : > { %1249 = vmatpush1.bf16.msra.mxu1 %v3329_v10 }
  0xb1   : > { %586 = vmatmul.mubr.bf16.gmra.mrb[12].mxu1 %v418_v57  ;;  %735 = vmatmul.mubr.bf16.gmra.mrb[12].mxu0 %v369_v58 }
  0xb2   : > { %890 = vmatpush1.bf16.msra.mxu0 %v3319_v59  ;;  %2902 = vmatprep.mubr.msk.bf16.mxu0 %vm217_vm0, %v3656_v24 }
  0xb3   : > { %891 = vmatprep.subr.bf16.mxu0 %v3411_v2  ;;  %1250 = vmatprep.subr.bf16.mxu1 %v3411_v2 }
  0xb4   : > { %1251 = vmatpush1.bf16.msra.mxu1 %v3330_v9 }
  0xb5   : > { %1252 = vmatprep.subr.bf16.mxu1 %v3411_v2 }
  0xb6   : > { %892 = vmatpush1.bf16.msra.mxu0 %v3320_v60 }
  0xb7   : > { %893 = vmatprep.subr.bf16.mxu0 %v3411_v2 }
  0xb8   : > { %1253 = vmatpush1.bf16.msra.mxu1 %v3331_v11 }
  0xb9   : > { %1254 = vmatprep.subr.bf16.mxu1 %v3411_v2 }
  0xba   : > { %894 = vmatpush1.bf16.msra.mxu0 %v3321_v61 }
  0xbb   : > { %895 = vmatprep.subr.bf16.mxu0 %v3411_v2 }
  0xbc   : > { %1255 = vmatpush1.bf16.msra.mxu1 %v3332_v12 }
  0xbd   : > { %1256 = vmatprep.subr.bf16.mxu1 %v3411_v2 }
  0xbe   : > { %896 = vmatpush1.bf16.msra.mxu0 %v3322_v62 }
  0xbf   : > { %897 = vmatprep.subr.bf16.mxu0 %v3411_v2 }
  0xc0   : > { %1257 = vmatpush1.bf16.msra.mxu1 %v3333_v13 }
  0xc1   : > { %1258 = vmatprep.subr.bf16.mxu1 %v3411_v2 }
  0xc2   : > { %898 = vmatpush1.bf16.msra.mxu0 %v3323_v63 }
  0xc3   : > { %899 = vmatprep.subr.bf16.mxu0 %v3411_v2 }
  0xc4   : > { %1259 = vmatpush1.bf16.msra.mxu1 %v3334_v30 }
  0xc5   : > { %1260 = vmatprep.subr.bf16.mxu1 %v3411_v2 }
  0xc6   : > { %900 = vmatpush1.bf16.msra.mxu0 %v3324_v0 }
  0xc7   : > { %1950 = vmatprep.subr.bf16.mxu0 %v3411_v2 }
  0xc8   : > { %1261 = vmatpush1.bf16.msra.mxu1 %v3335_v32 }
  0xc9   : > { %910 = vmatmul.mubr.bf16.vlgmr.msra.gmra.mrb[0].mxu0 %v365_v35  ;;  %1262 = vmatprep.subr.bf16.mxu1 %v3411_v2 }
  0xca   : > { %2903 = vmatprep.mubr.msk.bf16.mxu0 %vm217_vm0, %v368_v40 }
  0xcc   : > { %1263 = vmatpush1.bf16.msra.mxu1 %v3336_v38 }
  0xcd   : > { %1389 = vmatprep.subr.bf16.mxu1 %v3411_v2 }
  0xd1   : > { %918 = vmatmul.mubr.bf16.gmra.mrb[4].mxu0 %v367_v49 }
  0xd2   : > { %2904 = vmatprep.mubr.msk.bf16.mxu0 %vm217_vm0, %v370_v53 }
  0xd9   : > { %926 = vmatmul.mubr.bf16.gmra.mrb[8].mxu0 %v369_v58 }
  0xda   : > { %2905 = vmatprep.mubr.msk.bf16.mxu0 %vm217_vm0, %v767_v1 }
  0xe1   : > { %934 = vmatmul.mubr.bf16.gmra.mrb[12].mxu0 %v766_v3 }
 0x16c   : > { %v563_v14 = vpop.f32.mrb[0].mxu1 }
 0x16d   : > { %v565_v15 = vpop.f32.mrb[1].mxu1 }
 0x16e   : > { %v566_v16 = vpop.f32.mrb[2].mxu1 }
 0x16f   : > { %v568_v17 = vpop.f32.mrb[3].mxu1 }
 0x174   : > { %v571_v18 = vpop.f32.mrb[4].mxu1 }
 0x175   : > { %v573_v19 = vpop.f32.mrb[5].mxu1 }
 0x176   : > { %v574_v20 = vpop.f32.mrb[6].mxu1 }
 0x177   : > { %v576_v21 = vpop.f32.mrb[7].mxu1 }
 0x17c   : > { %v579_v22 = vpop.f32.mrb[8].mxu1 }
 0x17d   : > { %v581_v23 = vpop.f32.mrb[9].mxu1 }
 0x17e   : > { %v582_v24 = vpop.f32.mrb[10].mxu1 }
 0x17f   : > { %v584_v25 = vpop.f32.mrb[11].mxu1 }
 0x184   : > { %v3767_v26 = vpop.f32.mrb[12].mxu1 }
 0x185   : > { %v589_v27 = vpop.f32.mrb[13].mxu1 }
 0x186   : > { %v3769_v28 = vpop.f32.mrb[14].mxu1 }
 0x187   : > { %v592_v29 = vpop.f32.mrb[15].mxu1 }
 0x19c   : > { %v911_v31 = vpop.f32.mrb[0].mxu0 }
 0x19d   : > { %v3194_v33 = vadd.f32 %v911_v31, %v563_v14  ;;  %v913_v34 = vpop.f32.mrb[1].mxu0 }
 0x19e   : > { %v914_v35 = vpop.f32.mrb[2].mxu0 }
 0x19f   : > { %950 = vst.msk [vmem:[#allocation2 + $0x20] sm:$0xff] %vm217_vm0, %v3194_v33  ;;  %v3195_v36 = vadd.f32 %v914_v35, %v566_v16  ;;  %v916_v37 = vpop.f32.mrb[3].mxu0  ;;  %v3338_v35 = vld [vmem:[%s4531_s1 + $0x128] sm:$0xff]  }
 0x1a1   : > { %951 = vst.msk [vmem:[#allocation2 + $0x38] sm:$0xff] %vm217_vm0, %v3195_v36 }
 0x1a4   : > { %v919_v39 = vpop.f32.mrb[4].mxu0 }
 0x1a5   : > { %v3196_v40 = vadd.f32 %v919_v39, %v571_v18  ;;  %v921_v41 = vpop.f32.mrb[5].mxu0 }
 0x1a6   : > { %v922_v43 = vpop.f32.mrb[6].mxu0  ;;  %v979_v44 = vld [vmem:[#allocation2 + $0x20] sm:$0xff]  ;;  %v3339_v41 = vld [vmem:[%s4531_s1 + $0x130] sm:$0xff]  }
 0x1a7   : > { %v1039_v45 = vld [vmem:[#allocation2 + $0x21] sm:$0xff]  ;;  %952 = vst.msk [vmem:[#allocation2 + $0x50] sm:$0xff] %vm217_vm0, %v3196_v40  ;;  %v3197_v48 = vadd.f32 %v922_v43, %v574_v20  ;;  %1000 = vrot.lane.b32.xlu0 %v979_v44, %s3412_s8  ;;  %v924_v49 = vpop.f32.mrb[7].mxu0 }
 0x1a8   : > { %v959_v47 = vld [vmem:[#allocation2 + $0x1f] sm:$0xff]  ;;  %1049 = vst.msk [vmem:[#allocation3 + $0x18] sm:$0xff] %vm217_vm0, %v1039_v45  ;;  %v960_v52 = vld [vmem:[#allocation2 + $0x37] sm:$0xff] }
 0x1a9   : > { %969 = vst.msk [vmem:[#allocation3 + $0x10] sm:$0xff] %vm217_vm0, %v959_v47  ;;  %v980_v50 = vld [vmem:[#allocation2 + $0x38] sm:$0xff]  ;;  %953 = vst.msk [vmem:[#allocation2 + $0x68] sm:$0xff] %vm217_vm0, %v3197_v48 }
 0x1aa   : > { %v1040_v51 = vld [vmem:[#allocation2 + $0x39] sm:$0xff]  ;;  %1002 = vrot.lane.b32.xlu1 %v980_v50, %s3412_s8  ;;  %970 = vst.msk [vmem:[#allocation3 + $0x20] sm:$0xff] %vm217_vm0, %v960_v52 }
 0x1ab   : > { %1050 = vst.msk [vmem:[#allocation3 + $0x28] sm:$0xff] %vm217_vm0, %v1040_v51  ;;  %v3340_v47 = vld [vmem:[%s4531_s1 + $0x138] sm:$0xff]  }
 0x1ac   : > { %v927_v53 = vpop.f32.mrb[8].mxu0 }
 0x1ad   : > { %v3198_v54 = vadd.f32 %v927_v53, %v579_v22  ;;  %v929_v55 = vpop.f32.mrb[9].mxu0  ;;  %v3341_v53 = vld [vmem:[%s4531_s1 + $0x140] sm:$0xff]  }
 0x1ae   : > { %v930_v56 = vpop.f32.mrb[10].mxu0  ;;  %v981_v57 = vld [vmem:[#allocation2 + $0x50] sm:$0xff] }
 0x1af   : > { %v961_v58 = vld [vmem:[#allocation2 + $0x4f] sm:$0xff]  ;;  %954 = vst.msk [vmem:[#allocation2 + $0x80] sm:$0xff] %vm217_vm0, %v3198_v54  ;;  %v3199_v59 = vadd.f32 %v930_v56, %v582_v24  ;;  %1004 = vrot.lane.b32.xlu0 %v981_v57, %s3412_s8  ;;  %v932_v60 = vpop.f32.mrb[11].mxu0 }
 0x1b0   : > { %v3795_v61 = vld [vmem:[#allocation3 + $0x18] sm:$0xff]  ;;  %971 = vst.msk [vmem:[#allocation3 + $0x30] sm:$0xff] %vm217_vm0, %v961_v58  ;;  %v1041_v62 = vld [vmem:[#allocation2 + $0x51] sm:$0xff] }
 0x1b1   : > { %v982_v63 = vld [vmem:[#allocation2 + $0x68] sm:$0xff]  ;;  %1051 = vst.msk [vmem:[#allocation3 + $0x38] sm:$0xff] %vm217_vm0, %v1041_v62  ;;  %955 = vst.msk [vmem:[#allocation2 + $0x98] sm:$0xff] %vm217_vm0, %v3199_v59 }
 0x1b2   : > { %v3798_v0 = vld [vmem:[#allocation3 + $0x28] sm:$0xff]  ;;  %v962_v1 = vld [vmem:[#allocation2 + $0x67] sm:$0xff]  ;;  %1006 = vrot.lane.b32.xlu1 %v982_v63, %s3412_s8  ;;  %v3343_v63 = vld [vmem:[%s4531_s1 + $0x150] sm:$0xff]  }
 0x1b3   : > { %v1124_v3 = vpack.c.bf16 %v3798_v0, %v3795_v61  ;;  %972 = vst.msk [vmem:[#allocation3 + $0x40] sm:$0xff] %vm217_vm0, %v962_v1  ;;  %v1042_v5 = vld [vmem:[#allocation2 + $0x69] sm:$0xff] }
 0x1b4   : > { %1052 = vst.msk [vmem:[#allocation3 + $0x48] sm:$0xff] %vm217_vm0, %v1042_v5  ;;  %v935_v6 = vpop.f32.mrb[12].mxu0  ;;  %v3401_v24 = vld [vmem:[#allocation2 + $0x8] sm:$0xff]  ;;  %v3344_v5 = vld [vmem:[%s4531_s1 + $0x158] sm:$0xff]  }
 0x1b5   : > { %2966 = vmatprep.mubr.msk.bf16.mxu1 %vm217_vm0, %v1124_v3  ;;  %v3200_v46 = vadd.f32 %v935_v6, %v3767_v26  ;;  %v937_v8 = vpop.f32.mrb[13].mxu0  ;;  %v3342_v59 = vld [vmem:[%s4531_s1 + $0x148] sm:$0xff]   ;;  %v1075_v3 = vpack.c.bf16 %v3795_v61, %v3723_v4  ;;  %v3345_v6 = vld [vmem:[%s4531_s1 + $0x160] sm:$0xff]   ;;  %v3347_v61 = vld [vmem:[%s4531_s1 + $0x170] sm:$0xff]  }
 0x1b6   : > { %v938_v10 = vpop.f32.mrb[14].mxu0  ;;  %v983_v9 = vld [vmem:[#allocation2 + $0x80] sm:$0xff]  ;;  %v3346_v4 = vld [vmem:[%s4531_s1 + $0x168] sm:$0xff]  }
 0x1b7   : > { %v963_v11 = vld [vmem:[#allocation2 + $0x7f] sm:$0xff]  ;;  %956 = vst.msk [vmem:[#allocation2 + $0xb0] sm:$0xff] %vm217_vm0, %v3200_v46  ;;  %v3201_v13 = vadd.f32 %v938_v10, %v3769_v28  ;;  %1008 = vrot.lane.b32.xlu0 %v983_v9, %s3412_s8  ;;  %v940_v14 = vpop.f32.mrb[15].mxu0 }
 0x1b8   : > { %v1043_v12 = vld [vmem:[#allocation2 + $0x81] sm:$0xff]  ;;  %973 = vst.msk [vmem:[#allocation3 + $0x50] sm:$0xff] %vm217_vm0, %v963_v11  ;;  %v984_v15 = vld [vmem:[#allocation2 + $0x98] sm:$0xff] }
 0x1b9   : > { %1053 = vst.msk [vmem:[#allocation3 + $0x58] sm:$0xff] %vm217_vm0, %v1043_v12  ;;  %v964_v16 = vld [vmem:[#allocation2 + $0x97] sm:$0xff]  ;;  %957 = vst.msk [vmem:[#allocation2 + $0xc8] sm:$0xff] %vm217_vm0, %v3201_v13  ;;  %1010 = vrot.lane.b32.xlu1 %v984_v15, %s3412_s8  ;;  %v3842_v33 = vld [vmem:[#allocation3 + $0x38] sm:$0xff] }
 0x1ba   : > { %v1044_v17 = vld [vmem:[#allocation2 + $0x99] sm:$0xff]  ;;  %974 = vst.msk [vmem:[#allocation3 + $0x60] sm:$0xff] %vm217_vm0, %v964_v16  ;;  %v1077_v11 = vpack.c.bf16 %v3842_v33, %v3798_v0  ;;  %v3350_v12 = vld [vmem:[%s4531_s1 + $0x1e8] sm:$0xff]   ;;  %v3351_v13 = vld [vmem:[%s4531_s1 + $0x1f0] sm:$0xff]  }
 0x1bb   : > { %1054 = vst.msk [vmem:[#allocation3 + $0x68] sm:$0xff] %vm217_vm0, %v1044_v17  ;;  %v3830_v28 = vld [vmem:[#allocation3 + $0x48] sm:$0xff]  ;;  %v3349_v10 = vld [vmem:[%s4531_s1 + $0x1e0] sm:$0xff]  }
 0x1bc   : > { %v1126_v34 = vpack.c.bf16 %v3830_v28, %v3842_v33  ;;  %v3348_v46 = vld [vmem:[%s4531_s1 + $0x178] sm:$0xff]   ;;  %v3353_v16 = vld [vmem:[%s4531_s1 + $0x200] sm:$0xff]   ;;  %v4023_v33 = vld [vmem:[%s4531_s1 + $0x310] sm:$0xff]  }
 0x1bd   : > { %v3352_v15 = vld [vmem:[%s4531_s1 + $0x1f8] sm:$0xff]  }
 0x1be   : > { %v985_v18 = vld [vmem:[#allocation2 + $0xb0] sm:$0xff] }
 0x1bf   : > { %v965_v19 = vld [vmem:[#allocation2 + $0xaf] sm:$0xff]  ;;  %1012 = vrot.lane.b32.xlu0 %v985_v18, %s3412_s8 }
 0x1c0   : > { %975 = vst.msk [vmem:[#allocation3 + $0x70] sm:$0xff] %vm217_vm0, %v965_v19  ;;  %v1045_v20 = vld [vmem:[#allocation2 + $0xb1] sm:$0xff]  ;;  %v986_v21 = vld [vmem:[#allocation2 + $0xc8] sm:$0xff] }
 0x1c1   : > { %v966_v22 = vld [vmem:[#allocation2 + $0xc7] sm:$0xff]  ;;  %1055 = vst.msk [vmem:[#allocation3 + $0x78] sm:$0xff] %vm217_vm0, %v1045_v20  ;;  %1014 = vrot.lane.b32.xlu1 %v986_v21, %s3412_s8  ;;  %v3355_v20 = vld [vmem:[%s4531_s1 + $0x210] sm:$0xff]  }
 0x1c2   : > { %976 = vst.msk [vmem:[#allocation3 + $0x80] sm:$0xff] %vm217_vm0, %v966_v22  ;;  %v1046_v23 = vld [vmem:[#allocation2 + $0xc9] sm:$0xff]  ;;  %v3852_v37 = vld [vmem:[#allocation3 + $0x68] sm:$0xff] }
 0x1c3   : > { %1056 = vst.msk [vmem:[#allocation3 + $0x88] sm:$0xff] %vm217_vm0, %v1046_v23  ;;  %998 = vrot.lane.b32.xlu0 %v3401_v24, %s3412_s8  ;;  %v3865_v44 = vld [vmem:[#allocation3 + $0x58] sm:$0xff]  ;;  %v3356_v22 = vld [vmem:[%s4531_s1 + $0x218] sm:$0xff]   ;;  %v3357_v23 = vld [vmem:[%s4531_s1 + $0x220] sm:$0xff]  }
 0x1c4   : > { %v1128_v45 = vpack.c.bf16 %v3852_v37, %v3865_v44  ;;  %v1079_v0 = vpack.c.bf16 %v3865_v44, %v3830_v28  ;;  %v3354_v19 = vld [vmem:[%s4531_s1 + $0x208] sm:$0xff]   ;;  %v3376_v44 = vld [vmem:[%s4531_s1 + $0x2f0] sm:$0xff]  }
 0x1c5   : > { %1016 = vrot.lane.b32.xlu1 %v3569_v42, %s3412_s8  ;;  %v3337_v42 = vld [vmem:[%s4531_s1 + $0x120] sm:$0xff]   ;;  %v3358_v24 = vld [vmem:[%s4531_s1 + $0x228] sm:$0xff]  }
 0x1c8   : > { %v1120_v55 = vld [vmem:[#allocation3 + $0x78] sm:$0xff] }
 0x1c9   : > { %v1081_v18 = vpack.c.bf16 %v1120_v55, %v3852_v37  ;;  %v3366_v37 = vld [vmem:[%s4531_s1 + $0x2c8] sm:$0xff]  }
 0x1ca   : > { %v3875_v49 = vld [vmem:[#allocation3 + $0x88] sm:$0xff] }
 0x1cb   : > { %v1130_v57 = vpack.c.bf16 %v3875_v49, %v1120_v55 }
 0x219   : > { %v1001_v25 = vpop.permute.xlu0 %1000 }
 0x21a   : > { %1029 = vst.msk [vmem:[#allocation3 + $0x10] sm:$0xff] %vm316_vm2, %v1001_v25  ;;  %v3359_v25 = vld [vmem:[%s4531_s1 + $0x230] sm:$0xff]  }
 0x21c   : > { %v1003_v26 = vpop.permute.xlu1 %1002 }
 0x21d   : > { %1030 = vst.msk [vmem:[#allocation3 + $0x20] sm:$0xff] %vm316_vm2, %v1003_v26  ;;  %v3360_v26 = vld [vmem:[%s4531_s1 + $0x238] sm:$0xff]  }
 0x221   : > { %v1005_v27 = vpop.permute.xlu0 %1004  ;;  %v3832_v30 = vld [vmem:[#allocation3 + $0x10] sm:$0xff] }
 0x222   : > { %1031 = vst.msk [vmem:[#allocation3 + $0x30] sm:$0xff] %vm316_vm2, %v1005_v27  ;;  %v1477_v27 = vpack.c.bf16 %v3734_v7, %v3875_v49  ;;  %v4005_v7 = vld [vmem:[%s4531_s1 + $0x300] sm:$0xff]  }
 0x224   : > { %v1007_v29 = vpop.permute.xlu1 %1006  ;;  %v3834_v31 = vld [vmem:[#allocation3 + $0x20] sm:$0xff] }
 0x225   : > { %1032 = vst.msk [vmem:[#allocation3 + $0x40] sm:$0xff] %vm316_vm2, %v1007_v29  ;;  %v1123_v32 = vpack.c.bf16 %v3834_v31, %v3832_v30 }
 0x227   : > { %1273 = vmatmul.mubr.bf16.vlgmr.msra.gmra.mrb[16].mxu1 %v1123_v32  ;;  %v3363_v32 = vld [vmem:[%s4531_s1 + $0x2b0] sm:$0xff]  }
 0x228   : > { %1390 = vmatpush1.bf16.msra.mxu1 %v3337_v42  ;;  %2967 = vmatprep.mubr.msk.bf16.mxu1 %vm217_vm0, %v1126_v34  ;;  %v4012_v42 = vld [vmem:[%s4531_s1 + $0x308] sm:$0xff]   ;;  %v3364_v34 = vld [vmem:[%s4531_s1 + $0x2b8] sm:$0xff]  }
 0x229   : > { %1391 = vmatprep.subr.bf16.mxu1 %v3411_v2  ;;  %v1009_v36 = vpop.permute.xlu0 %1008  ;;  %v3854_v39 = vld [vmem:[#allocation3 + $0x30] sm:$0xff] }
 0x22a   : > { %1033 = vst.msk [vmem:[#allocation3 + $0x50] sm:$0xff] %vm316_vm2, %v1009_v36  ;;  %v1076_v14 = vpack.c.bf16 %v3854_v39, %v3834_v31  ;;  %v3362_v31 = vld [vmem:[%s4531_s1 + $0x2a8] sm:$0xff]   ;;  %v3365_v36 = vld [vmem:[%s4531_s1 + $0x2c0] sm:$0xff]  }
 0x22b   : > { %v1011_v38 = vpop.permute.xlu1 %1010 }
 0x22c   : > { %1392 = vmatpush1.bf16.msra.mxu1 %v3338_v35  ;;  %v3856_v40 = vld [vmem:[#allocation3 + $0x40] sm:$0xff]  ;;  %1034 = vst.msk [vmem:[#allocation3 + $0x60] sm:$0xff] %vm316_vm2, %v1011_v38  ;;  %v4034_v35 = vld [vmem:[%s4531_s1 + $0x318] sm:$0xff]  }
 0x22d   : > { %1393 = vmatprep.subr.bf16.mxu1 %v3411_v2  ;;  %v1125_v43 = vpack.c.bf16 %v3856_v40, %v3854_v39  ;;  %v3368_v38 = vld [vmem:[%s4531_s1 + $0x2d0] sm:$0xff]   ;;  %v3370_v39 = vld [vmem:[%s4531_s1 + $0x2d8] sm:$0xff]  }
 0x22f   : > { %1281 = vmatmul.mubr.bf16.gmra.mrb[20].mxu1 %v1125_v43  ;;  %v4067_v43 = vld [vmem:[%s4531_s1 + $0x320] sm:$0xff]  }
 0x230   : > { %1394 = vmatpush1.bf16.msra.mxu1 %v3339_v41  ;;  %2968 = vmatprep.mubr.msk.bf16.mxu1 %vm217_vm0, %v1128_v45  ;;  %v3374_v41 = vld [vmem:[%s4531_s1 + $0x2e8] sm:$0xff]  }
 0x231   : > { %1395 = vmatprep.subr.bf16.mxu1 %v3411_v2  ;;  %v1013_v48 = vpop.permute.xlu0 %1012  ;;  %v3877_v51 = vld [vmem:[#allocation3 + $0x50] sm:$0xff]  ;;  %v4076_v45 = vld [vmem:[%s4531_s1 + $0x328] sm:$0xff]  }
 0x232   : > { %1035 = vst.msk [vmem:[#allocation3 + $0x70] sm:$0xff] %vm316_vm2, %v1013_v48  ;;  %v1078_v17 = vpack.c.bf16 %v3877_v51, %v3856_v40  ;;  %v3372_v40 = vld [vmem:[%s4531_s1 + $0x2e0] sm:$0xff]  }
 0x233   : > { %v1015_v50 = vpop.permute.xlu1 %1014  ;;  %v3879_v52 = vld [vmem:[#allocation3 + $0x60] sm:$0xff] }
 0x234   : > { %1396 = vmatpush1.bf16.msra.mxu1 %v3340_v47  ;;  %1036 = vst.msk [vmem:[#allocation3 + $0x80] sm:$0xff] %vm316_vm2, %v1015_v50  ;;  %v1127_v54 = vpack.c.bf16 %v3879_v52, %v3877_v51  ;;  %v3378_v51 = vld [vmem:[%s4531_s1 + $0x2f8] sm:$0xff]  }
 0x235   : > { %1397 = vmatprep.subr.bf16.mxu1 %v3411_v2  ;;  %v999_v56 = vpop.permute.xlu0 %998 }
 0x236   : > { %1028 = vst.msk [vmem:[#allocation3] sm:$0xff] %vm316_vm2, %v999_v56 }
 0x237   : > { %1289 = vmatmul.mubr.bf16.gmra.mrb[24].mxu1 %v1127_v54  ;;  %v1017_v58 = vpop.permute.xlu1 %1016 }
 0x238   : > { %1398 = vmatpush1.bf16.msra.mxu1 %v3341_v53  ;;  %2969 = vmatprep.mubr.msk.bf16.mxu1 %vm217_vm0, %v1130_v57  ;;  %1037 = vst.msk [vmem:[#allocation3 + $0x90] sm:$0xff] %vm316_vm2, %v1017_v58 }
 0x239   : > { %1399 = vmatprep.subr.bf16.mxu1 %v3411_v2  ;;  %v1119_v60 = vld [vmem:[#allocation3 + $0x70] sm:$0xff] }
 0x23a   : > { %v1080_v21 = vpack.c.bf16 %v1119_v60, %v3879_v52  ;;  %v4091_v52 = vld [vmem:[%s4531_s1 + $0x330] sm:$0xff]  }
 0x23b   : > { %v3896_v62 = vld [vmem:[#allocation3 + $0x80] sm:$0xff] }
 0x23c   : > { %1400 = vmatpush1.bf16.msra.mxu1 %v3342_v59  ;;  %v1129_v1 = vpack.c.bf16 %v3896_v62, %v1119_v60 }
 0x23d   : > { %1401 = vmatprep.subr.bf16.mxu1 %v3411_v2  ;;  %v1058_v8 = vld [vmem:[#allocation3] sm:$0xff] }
 0x23e   : > { %v1074_v9 = vpack.c.bf16 %v3832_v30, %v1058_v8  ;;  %v3361_v30 = vld [vmem:[%s4531_s1 + $0x2a0] sm:$0xff]  }
 0x23f   : > { %1297 = vmatmul.mubr.bf16.gmra.mrb[28].mxu1 %v1129_v1  ;;  %v1468_v28 = vld [vmem:[#allocation3 + $0x90] sm:$0xff]  ;;  %1951 = vmatpush1.bf16.msra.mxu0 %v3361_v30  ;;  %v4106_v1 = vld [vmem:[%s4531_s1 + $0x338] sm:$0xff]   ;;  %v4168_v30 = vld [vmem:[#allocation3 + $0x98] sm:$0xff] }
 0x240   : > { %1402 = vmatpush1.bf16.msra.mxu1 %v3343_v63  ;;  %2982 = vmatprep.mubr.msk.bf16.mxu1 %vm217_vm0, %v1075_v3  ;;  %v1476_v29 = vpack.c.bf16 %v1468_v28, %v3896_v62  ;;  %v4113_v3 = vld [vmem:[%s4531_s1 + $0x340] sm:$0xff]  }
 0x241   : > { %1403 = vmatprep.subr.bf16.mxu1 %v3411_v2  ;;  %1952 = vmatprep.subr.bf16.mxu0 %v3411_v2 }
 0x243   : > { %1953 = vmatpush1.bf16.msra.mxu0 %v3362_v31  ;;  %v2467_v31 = vld [vmem:[#allocation2 + $0xe1] sm:$0xff] }
 0x244   : > { %1404 = vmatpush1.bf16.msra.mxu1 %v3344_v5  ;;  %1954 = vmatprep.subr.bf16.mxu0 %v3411_v2  ;;  %2477 = vst.msk [vmem:[#allocation3 + $0x98] sm:$0xff] %vm217_vm0, %v2467_v31 }
 0x245   : > { %1405 = vmatprep.subr.bf16.mxu1 %v3411_v2 }
 0x247   : > { %1955 = vmatpush1.bf16.msra.mxu0 %v3363_v32 }
 0x248   : > { %1406 = vmatpush1.bf16.msra.mxu1 %v3345_v6  ;;  %1956 = vmatprep.subr.bf16.mxu0 %v3411_v2 }
 0x249   : > { %1407 = vmatprep.subr.bf16.mxu1 %v3411_v2 }
 0x24b   : > { %1957 = vmatpush1.bf16.msra.mxu0 %v3364_v34 }
 0x24c   : > { %1408 = vmatpush1.bf16.msra.mxu1 %v3346_v4  ;;  %1958 = vmatprep.subr.bf16.mxu0 %v3411_v2 }
 0x24d   : > { %1409 = vmatprep.subr.bf16.mxu1 %v3411_v2 }
 0x24f   : > { %1959 = vmatpush1.bf16.msra.mxu0 %v3365_v36 }
 0x250   : > { %1410 = vmatpush1.bf16.msra.mxu1 %v3347_v61  ;;  %1960 = vmatprep.subr.bf16.mxu0 %v3411_v2 }
 0x251   : > { %1411 = vmatprep.subr.bf16.mxu1 %v3411_v2 }
 0x253   : > { %1961 = vmatpush1.bf16.msra.mxu0 %v3366_v37  ;;  %v4173_v37 = vld [vmem:[#allocation3 + $0x8] sm:$0xff] }
 0x254   : > { %1412 = vmatpush1.bf16.msra.mxu1 %v3348_v46  ;;  %1962 = vmatprep.subr.bf16.mxu0 %v3411_v2 }
 0x255   : > { %1587 = vmatprep.subr.bf16.mxu1 %v3411_v2 }
 0x257   : > { %1422 = vmatmul.mubr.bf16.vlgmr.msra.gmra.mrb[16].mxu1 %v1074_v9  ;;  %1963 = vmatpush1.bf16.msra.mxu0 %v3368_v38  ;;  %v2458_v38 = vld [vmem:[#allocation2 + $0x9] sm:$0xff] }
 0x258   : > { %2983 = vmatprep.mubr.msk.bf16.mxu1 %vm217_vm0, %v1077_v11  ;;  %1588 = vmatpush1.bf16.msra.mxu1 %v3349_v10  ;;  %2468 = vst.msk [vmem:[#allocation3 + $0x8] sm:$0xff] %vm217_vm0, %v2458_v38  ;;  %v3391_v38 = vld [vmem:[%s4531_s1 + $0x270] sm:$0xff]  }
 0x259   : > { %1589 = vmatprep.subr.bf16.mxu1 %v3411_v2  ;;  %1964 = vmatprep.subr.bf16.mxu0 %v3411_v2 }
 0x25b   : > { %1965 = vmatpush1.bf16.msra.mxu0 %v3370_v39 }
 0x25c   : > { %1590 = vmatpush1.bf16.msra.mxu1 %v3350_v12  ;;  %1966 = vmatprep.subr.bf16.mxu0 %v3411_v2 }
 0x25d   : > { %1591 = vmatprep.subr.bf16.mxu1 %v3411_v2 }
 0x25f   : > { %1430 = vmatmul.mubr.bf16.gmra.mrb[20].mxu1 %v1076_v14  ;;  %1967 = vmatpush1.bf16.msra.mxu0 %v3372_v40  ;;  %v1688_v40 = vld [vmem:[#allocation2 + $0x8] sm:$0xff] }
 0x260   : > { %2984 = vmatprep.mubr.msk.bf16.mxu1 %vm217_vm0, %v1079_v0  ;;  %1592 = vmatpush1.bf16.msra.mxu1 %v3351_v13 }
 0x261   : > { %1593 = vmatprep.subr.bf16.mxu1 %v3411_v2  ;;  %1968 = vmatprep.subr.bf16.mxu0 %v3411_v2 }
 0x263   : > { %1969 = vmatpush1.bf16.msra.mxu0 %v3374_v41 }
 0x264   : > { %1594 = vmatpush1.bf16.msra.mxu1 %v3352_v15  ;;  %1970 = vmatprep.subr.bf16.mxu0 %v3411_v2  ;;  %v4133_v15 = vld [vmem:[%s4531_s1 + $0x348] sm:$0xff]  }
 0x265   : > { %1595 = vmatprep.subr.bf16.mxu1 %v3411_v2 }
 0x267   : > { %1438 = vmatmul.mubr.bf16.gmra.mrb[24].mxu1 %v1078_v17  ;;  %1971 = vmatpush1.bf16.msra.mxu0 %v3376_v44 }
 0x268   : > { %2985 = vmatprep.mubr.msk.bf16.mxu1 %vm217_vm0, %v1081_v18  ;;  %1596 = vmatpush1.bf16.msra.mxu1 %v3353_v16  ;;  %v4142_v16 = vld [vmem:[%s4531_s1 + $0x350] sm:$0xff]  }
 0x269   : > { %1597 = vmatprep.subr.bf16.mxu1 %v3411_v2  ;;  %1972 = vmatprep.subr.bf16.mxu0 %v3411_v2 }
 0x26b   : > { %1973 = vmatpush1.bf16.msra.mxu0 %v3378_v51 }
 0x26c   : > { %1598 = vmatpush1.bf16.msra.mxu1 %v3354_v19  ;;  %2099 = vmatprep.subr.bf16.mxu0 %v3411_v2 }
 0x26d   : > { %1599 = vmatprep.subr.bf16.mxu1 %v3411_v2 }
 0x26f   : > { %1446 = vmatmul.mubr.bf16.gmra.mrb[28].mxu1 %v1080_v21 }
 0x270   : > { %1600 = vmatpush1.bf16.msra.mxu1 %v3355_v20  ;;  %3022 = vmatprep.mubr.msk.bf16.mxu1 %vm217_vm0, %v1077_v11 }
 0x271   : > { %1601 = vmatprep.subr.bf16.mxu1 %v3411_v2 }
 0x274   : > { %1602 = vmatpush1.bf16.msra.mxu1 %v3356_v22 }
 0x275   : > { %1603 = vmatprep.subr.bf16.mxu1 %v3411_v2 }
 0x278   : > { %1604 = vmatpush1.bf16.msra.mxu1 %v3357_v23  ;;  %v4152_v23 = vld [vmem:[#allocation2 + $0xdf] sm:$0xff] }
 0x279   : > { %1605 = vmatprep.subr.bf16.mxu1 %v3411_v2  ;;  %1687 = vst.msk [vmem:[#allocation3 + $0x90] sm:$0xff] %vm217_vm0, %v4152_v23 }
 0x27c   : > { %1606 = vmatpush1.bf16.msra.mxu1 %v3358_v24 }
 0x27d   : > { %1607 = vmatprep.subr.bf16.mxu1 %v3411_v2 }
 0x280   : > { %1608 = vmatpush1.bf16.msra.mxu1 %v3359_v25 }
 0x281   : > { %1609 = vmatprep.subr.bf16.mxu1 %v3411_v2 }
 0x284   : > { %1610 = vmatpush1.bf16.msra.mxu1 %v3360_v26 }
 0x285   : > { %3170 = vmatprep.subr.bf16.mxu1 %v3411_v2 }
 0x287   : > { %1620 = vmatmul.mubr.bf16.vlgmr.msra.gmra.mrb[16].mxu1 %v1076_v14 }
 0x288   : > { %3023 = vmatprep.mubr.msk.bf16.mxu1 %vm217_vm0, %v1079_v0  ;;  %3182 = vmatpush1.bf16.msra.mxu1 %v4005_v7 }
 0x289   : > { %3171 = vmatprep.subr.bf16.mxu1 %v3411_v2 }
 0x28c   : > { %3183 = vmatpush1.bf16.msra.mxu1 %v4012_v42 }
 0x28d   : > { %3172 = vmatprep.subr.bf16.mxu1 %v3411_v2 }
 0x28f   : > { %1628 = vmatmul.mubr.bf16.gmra.mrb[20].mxu1 %v1078_v17  ;;  %v4144_v17 = vld [vmem:[#allocation2 + $0x7] sm:$0xff] }
 0x290   : > { %3024 = vmatprep.mubr.msk.bf16.mxu1 %vm217_vm0, %v1081_v18  ;;  %3184 = vmatpush1.bf16.msra.mxu1 %v4023_v33  ;;  %1678 = vst.msk [vmem:[#allocation3] sm:$0xff] %vm217_vm0, %v4144_v17 }
 0x291   : > { %3173 = vmatprep.subr.bf16.mxu1 %v3411_v2 }
 0x294   : > { %3185 = vmatpush1.bf16.msra.mxu1 %v4034_v35 }
 0x295   : > { %3174 = vmatprep.subr.bf16.mxu1 %v3411_v2 }
 0x297   : > { %1636 = vmatmul.mubr.bf16.gmra.mrb[24].mxu1 %v1080_v21 }
 0x298   : > { %3025 = vmatprep.mubr.msk.bf16.mxu1 %vm217_vm0, %v1477_v27  ;;  %3186 = vmatpush1.bf16.msra.mxu1 %v4067_v43 }
 0x299   : > { %3175 = vmatprep.subr.bf16.mxu1 %v3411_v2 }
 0x29c   : > { %3187 = vmatpush1.bf16.msra.mxu1 %v4076_v45 }
 0x29d   : > { %3176 = vmatprep.subr.bf16.mxu1 %v3411_v2 }
 0x29f   : > { %1644 = vmatmul.mubr.bf16.gmra.mrb[28].mxu1 %v1476_v29  ;;  %v4164_v29 = vld [vmem:[%s4531_s1 + $0x358] sm:$0xff]  }
 0x2a0   : > { %3188 = vmatpush1.bf16.msra.mxu1 %v4091_v52 }
 0x2a1   : > { %3177 = vmatprep.subr.bf16.mxu1 %v3411_v2 }
 0x2a4   : > { %3189 = vmatpush1.bf16.msra.mxu1 %v4106_v1 }
 0x2a5   : > { %3178 = vmatprep.subr.bf16.mxu1 %v3411_v2 }
 0x2a8   : > { %3190 = vmatpush1.bf16.msra.mxu1 %v4113_v3 }
 0x2a9   : > { %3179 = vmatprep.subr.bf16.mxu1 %v3411_v2 }
 0x2ac   : > { %3191 = vmatpush1.bf16.msra.mxu1 %v4133_v15 }
 0x2ad   : > { %3180 = vmatprep.subr.bf16.mxu1 %v3411_v2 }
 0x2b0   : > { %3192 = vmatpush1.bf16.msra.mxu1 %v4142_v16 }
 0x2b1   : > { %3181 = vmatprep.subr.bf16.mxu1 %v3411_v2 }
 0x2b4   : > { %3193 = vmatpush1.bf16.msra.mxu1 %v4164_v29 }
 0x35a   : > { %v1621_v47 = vpop.f32.mrb[16].mxu1 }
 0x35b   : > { %1660 = vst.msk [vmem:[#allocation2 + $0x20] sm:$0xff] %vm217_vm0, %v1621_v47  ;;  %v1623_v48 = vpop.f32.mrb[17].mxu1  ;;  %v4179_v47 = vld [vmem:[#allocation2 + $0xe0] sm:$0xff] }
 0x35c   : > { %v1624_v49 = vpop.f32.mrb[18].mxu1 }
 0x35d   : > { %1661 = vst.msk [vmem:[#allocation2 + $0x38] sm:$0xff] %vm217_vm0, %v1624_v49  ;;  %v1626_v50 = vpop.f32.mrb[19].mxu1 }
 0x362   : > { %v1629_v53 = vpop.f32.mrb[20].mxu1  ;;  %v1689_v54 = vld [vmem:[#allocation2 + $0x20] sm:$0xff] }
 0x363   : > { %v1749_v55 = vld [vmem:[#allocation2 + $0x21] sm:$0xff]  ;;  %1662 = vst.msk [vmem:[#allocation2 + $0x50] sm:$0xff] %vm217_vm0, %v1629_v53  ;;  %1710 = vrot.lane.b32.xlu0 %v1689_v54, %s3412_s8  ;;  %v1631_v57 = vpop.f32.mrb[21].mxu1 }
 0x364   : > { %v1669_v56 = vld [vmem:[#allocation2 + $0x1f] sm:$0xff]  ;;  %1759 = vst.msk [vmem:[#allocation3 + $0x18] sm:$0xff] %vm217_vm0, %v1749_v55  ;;  %v1632_v59 = vpop.f32.mrb[22].mxu1  ;;  %v1670_v62 = vld [vmem:[#allocation2 + $0x37] sm:$0xff] }
 0x365   : > { %1679 = vst.msk [vmem:[#allocation3 + $0x10] sm:$0xff] %vm217_vm0, %v1669_v56  ;;  %v1750_v58 = vld [vmem:[#allocation2 + $0x39] sm:$0xff]  ;;  %1663 = vst.msk [vmem:[#allocation2 + $0x68] sm:$0xff] %vm217_vm0, %v1632_v59  ;;  %v1634_v63 = vpop.f32.mrb[23].mxu1 }
 0x366   : > { %v1690_v60 = vld [vmem:[#allocation2 + $0x38] sm:$0xff]  ;;  %1760 = vst.msk [vmem:[#allocation3 + $0x28] sm:$0xff] %vm217_vm0, %v1750_v58  ;;  %1680 = vst.msk [vmem:[#allocation3 + $0x20] sm:$0xff] %vm217_vm0, %v1670_v62  ;;  %v3380_v59 = vld [vmem:[%s4531_s1 + $0x240] sm:$0xff]  }
 0x367   : > { %1712 = vrot.lane.b32.xlu1 %v1690_v60, %s3412_s8 }
 0x36a   : > { %v1751_v5 = vld [vmem:[#allocation2 + $0x51] sm:$0xff]  ;;  %v1637_v6 = vpop.f32.mrb[24].mxu1 }
 0x36b   : > { %v1691_v4 = vld [vmem:[#allocation2 + $0x50] sm:$0xff]  ;;  %1761 = vst.msk [vmem:[#allocation3 + $0x38] sm:$0xff] %vm217_vm0, %v1751_v5  ;;  %1664 = vst.msk [vmem:[#allocation2 + $0x80] sm:$0xff] %vm217_vm0, %v1637_v6  ;;  %v1639_v61 = vpop.f32.mrb[25].mxu1  ;;  %v4118_v46 = vld [vmem:[#allocation3 + $0x18] sm:$0xff] }
 0x36c   : > { %1714 = vrot.lane.b32.xlu0 %v1691_v4, %s3412_s8  ;;  %v1671_v8 = vld [vmem:[#allocation2 + $0x4f] sm:$0xff]  ;;  %v1640_v9 = vpop.f32.mrb[26].mxu1  ;;  %v1672_v0 = vld [vmem:[#allocation2 + $0x67] sm:$0xff] }
 0x36d   : > { %v1752_v10 = vld [vmem:[#allocation2 + $0x69] sm:$0xff]  ;;  %v4121_v12 = vld [vmem:[#allocation3 + $0x28] sm:$0xff]  ;;  %1681 = vst.msk [vmem:[#allocation3 + $0x30] sm:$0xff] %vm217_vm0, %v1671_v8  ;;  %1665 = vst.msk [vmem:[#allocation2 + $0x98] sm:$0xff] %vm217_vm0, %v1640_v9  ;;  %v1642_v13 = vpop.f32.mrb[27].mxu1 }
 0x36e   : > { %v1692_v11 = vld [vmem:[#allocation2 + $0x68] sm:$0xff]  ;;  %1762 = vst.msk [vmem:[#allocation3 + $0x48] sm:$0xff] %vm217_vm0, %v1752_v10  ;;  %v1834_v14 = vpack.c.bf16 %v4121_v12, %v4118_v46  ;;  %1682 = vst.msk [vmem:[#allocation3 + $0x40] sm:$0xff] %vm217_vm0, %v1672_v0  ;;  %v3384_v10 = vld [vmem:[%s4531_s1 + $0x250] sm:$0xff]  }
 0x36f   : > { %1716 = vrot.lane.b32.xlu1 %v1692_v11, %s3412_s8  ;;  %v3382_v5 = vld [vmem:[%s4531_s1 + $0x248] sm:$0xff]  }
 0x370   : > { %3086 = vmatprep.mubr.msk.bf16.mxu0 %vm217_vm0, %v1834_v14  ;;  %v3386_v14 = vld [vmem:[%s4531_s1 + $0x258] sm:$0xff]  }
 0x372   : > { %v1753_v18 = vld [vmem:[#allocation2 + $0x81] sm:$0xff]  ;;  %v1645_v19 = vpop.f32.mrb[28].mxu1 }
 0x373   : > { %v1693_v20 = vld [vmem:[#allocation2 + $0x80] sm:$0xff]  ;;  %1763 = vst.msk [vmem:[#allocation3 + $0x58] sm:$0xff] %vm217_vm0, %v1753_v18  ;;  %1666 = vst.msk [vmem:[#allocation2 + $0xb0] sm:$0xff] %vm217_vm0, %v1645_v19  ;;  %v1647_v21 = vpop.f32.mrb[29].mxu1  ;;  %v4205_v62 = vld [vmem:[#allocation3 + $0x38] sm:$0xff] }
 0x374   : > { %1718 = vrot.lane.b32.xlu0 %v1693_v20, %s3412_s8  ;;  %v1673_v22 = vld [vmem:[#allocation2 + $0x7f] sm:$0xff]  ;;  %v1648_v25 = vpop.f32.mrb[30].mxu1  ;;  %v1674_v28 = vld [vmem:[#allocation2 + $0x97] sm:$0xff] }
 0x375   : > { %v1754_v24 = vld [vmem:[#allocation2 + $0x99] sm:$0xff]  ;;  %1683 = vst.msk [vmem:[#allocation3 + $0x50] sm:$0xff] %vm217_vm0, %v1673_v22  ;;  %1667 = vst.msk [vmem:[#allocation2 + $0xc8] sm:$0xff] %vm217_vm0, %v1648_v25  ;;  %v1650_v27 = vpop.f32.mrb[31].mxu1 }
 0x376   : > { %v1694_v26 = vld [vmem:[#allocation2 + $0x98] sm:$0xff]  ;;  %1764 = vst.msk [vmem:[#allocation3 + $0x68] sm:$0xff] %vm217_vm0, %v1754_v24  ;;  %1684 = vst.msk [vmem:[#allocation3 + $0x60] sm:$0xff] %vm217_vm0, %v1674_v28  ;;  %v3388_v22 = vld [vmem:[%s4531_s1 + $0x260] sm:$0xff]  }
 0x377   : > { %1720 = vrot.lane.b32.xlu1 %v1694_v26, %s3412_s8  ;;  %v4193_v55 = vld [vmem:[#allocation3 + $0x48] sm:$0xff]  ;;  %v3390_v28 = vld [vmem:[%s4531_s1 + $0x268] sm:$0xff]  }
 0x378   : > { %v1836_v63 = vpack.c.bf16 %v4193_v55, %v4205_v62 }
 0x37a   : > { %v1755_v32 = vld [vmem:[#allocation2 + $0xb1] sm:$0xff]  ;;  %v4226_v11 = vld [vmem:[#allocation3 + $0x58] sm:$0xff] }
 0x37b   : > { %v1695_v34 = vld [vmem:[#allocation2 + $0xb0] sm:$0xff]  ;;  %1765 = vst.msk [vmem:[#allocation3 + $0x78] sm:$0xff] %vm217_vm0, %v1755_v32 }
 0x37c   : > { %1722 = vrot.lane.b32.xlu0 %v1695_v34, %s3412_s8  ;;  %v1675_v36 = vld [vmem:[#allocation2 + $0xaf] sm:$0xff]  ;;  %v1676_v41 = vld [vmem:[#allocation2 + $0xc7] sm:$0xff] }
 0x37d   : > { %v1696_v39 = vld [vmem:[#allocation2 + $0xc8] sm:$0xff]  ;;  %1685 = vst.msk [vmem:[#allocation3 + $0x70] sm:$0xff] %vm217_vm0, %v1675_v36  ;;  %1686 = vst.msk [vmem:[#allocation3 + $0x80] sm:$0xff] %vm217_vm0, %v1676_v41  ;;  %v2173_v48 = vld [vmem:[#allocation3 + $0x68] sm:$0xff] }
 0x37e   : > { %1724 = vrot.lane.b32.xlu1 %v1696_v39, %s3412_s8  ;;  %v1756_v44 = vld [vmem:[#allocation2 + $0xc9] sm:$0xff]  ;;  %v1838_v13 = vpack.c.bf16 %v2173_v48, %v4226_v11 }
 0x37f   : > { %1766 = vst.msk [vmem:[#allocation3 + $0x88] sm:$0xff] %vm217_vm0, %v1756_v44 }
 0x380   : > { %1708 = vrot.lane.b32.xlu0 %v1688_v40, %s3412_s8 }
 0x382   : > { %1726 = vrot.lane.b32.xlu1 %v4179_v47, %s3412_s8  ;;  %v2175_v49 = vld [vmem:[#allocation3 + $0x78] sm:$0xff] }
 0x383   : > { %v4185_v50 = vpack.c.bf16 %v2175_v49, %v2173_v48 }
 0x384   : > { %2418 = vrot.lane.b32.xlu0 %v1688_v40, %s3412_s8  ;;  %v1785_v40 = vpack.c.bf16 %v4118_v46, %v4173_v37  ;;  %v3393_v46 = vld [vmem:[%s4531_s1 + $0x280] sm:$0xff]   ;;  %v3396_v37 = vld [vmem:[%s4531_s1 + $0x298] sm:$0xff]  }
 0x385   : > { %3144 = vmatprep.mubr.msk.bf16.mxu1 %vm217_vm0, %v4185_v50 }
 0x386   : > { %v1832_v18 = vld [vmem:[#allocation3 + $0x88] sm:$0xff] }
 0x387   : > { %v1840_v26 = vpack.c.bf16 %v1832_v18, %v2175_v49  ;;  %v2187_v34 = vpack.c.bf16 %v4168_v30, %v1832_v18  ;;  %v3392_v30 = vld [vmem:[%s4531_s1 + $0x278] sm:$0xff]  }
 0x3d5   : > { %v1711_v51 = vpop.permute.xlu0 %1710 }
 0x3d6   : > { %1739 = vst.msk [vmem:[#allocation3 + $0x10] sm:$0xff] %vm316_vm2, %v1711_v51  ;;  %v1787_v51 = vpack.c.bf16 %v4205_v62, %v4121_v12 }
 0x3d9   : > { %v1713_v53 = vpop.permute.xlu1 %1712 }
 0x3da   : > { %1740 = vst.msk [vmem:[#allocation3 + $0x20] sm:$0xff] %vm316_vm2, %v1713_v53 }
 0x3dd   : > { %v4195_v57 = vld [vmem:[#allocation3 + $0x10] sm:$0xff] }
 0x3de   : > { %v1715_v54 = vpop.permute.xlu0 %1714 }
 0x3df   : > { %1741 = vst.msk [vmem:[#allocation3 + $0x30] sm:$0xff] %vm316_vm2, %v1715_v54  ;;  %v1789_v54 = vpack.c.bf16 %v4226_v11, %v4193_v55 }
 0x3e1   : > { %v1717_v56 = vpop.permute.xlu1 %1716  ;;  %v4197_v58 = vld [vmem:[#allocation3 + $0x20] sm:$0xff] }
 0x3e2   : > { %1742 = vst.msk [vmem:[#allocation3 + $0x40] sm:$0xff] %vm316_vm2, %v1717_v56  ;;  %v1833_v60 = vpack.c.bf16 %v4197_v58, %v4195_v57 }
 0x3e4   : > { %1983 = vmatmul.mubr.bf16.vlgmr.msra.gmra.mrb[16].mxu0 %v1833_v60 }
 0x3e5   : > { %2100 = vmatpush1.bf16.msra.mxu0 %v3380_v59  ;;  %3087 = vmatprep.mubr.msk.bf16.mxu0 %vm217_vm0, %v1836_v63 }
 0x3e6   : > { %2101 = vmatprep.subr.bf16.mxu0 %v3411_v2  ;;  %v1719_v6 = vpop.permute.xlu0 %1718  ;;  %v4215_v61 = vld [vmem:[#allocation3 + $0x30] sm:$0xff] }
 0x3e7   : > { %1743 = vst.msk [vmem:[#allocation3 + $0x50] sm:$0xff] %vm316_vm2, %v1719_v6  ;;  %v1786_v53 = vpack.c.bf16 %v4215_v61, %v4197_v58 }
 0x3e9   : > { %2102 = vmatpush1.bf16.msra.mxu0 %v3382_v5  ;;  %v1721_v4 = vpop.permute.xlu1 %1720  ;;  %v4217_v8 = vld [vmem:[#allocation3 + $0x40] sm:$0xff] }
 0x3ea   : > { %1744 = vst.msk [vmem:[#allocation3 + $0x60] sm:$0xff] %vm316_vm2, %v1721_v4  ;;  %2103 = vmatprep.subr.bf16.mxu0 %v3411_v2  ;;  %v1835_v9 = vpack.c.bf16 %v4217_v8, %v4215_v61 }
 0x3ec   : > { %1991 = vmatmul.mubr.bf16.gmra.mrb[20].mxu0 %v1835_v9 }
 0x3ed   : > { %2104 = vmatpush1.bf16.msra.mxu0 %v3384_v10  ;;  %3088 = vmatprep.mubr.msk.bf16.mxu0 %vm217_vm0, %v1838_v13 }
 0x3ee   : > { %2105 = vmatprep.subr.bf16.mxu0 %v3411_v2  ;;  %v1723_v0 = vpop.permute.xlu0 %1722  ;;  %v4235_v20 = vld [vmem:[#allocation3 + $0x50] sm:$0xff] }
 0x3ef   : > { %1745 = vst.msk [vmem:[#allocation3 + $0x70] sm:$0xff] %vm316_vm2, %v1723_v0 }
 0x3f0   : > { %v1725_v19 = vpop.permute.xlu1 %1724 }
 0x3f1   : > { %2106 = vmatpush1.bf16.msra.mxu0 %v3386_v14  ;;  %v1827_v21 = vld [vmem:[#allocation3 + $0x60] sm:$0xff]  ;;  %1746 = vst.msk [vmem:[#allocation3 + $0x80] sm:$0xff] %vm316_vm2, %v1725_v19 }
 0x3f2   : > { %2107 = vmatprep.subr.bf16.mxu0 %v3411_v2  ;;  %v1837_v24 = vpack.c.bf16 %v1827_v21, %v4235_v20  ;;  %v1709_v25 = vpop.permute.xlu0 %1708 }
 0x3f3   : > { %1738 = vst.msk [vmem:[#allocation3] sm:$0xff] %vm316_vm2, %v1709_v25 }
 0x3f4   : > { %1999 = vmatmul.mubr.bf16.gmra.mrb[24].mxu0 %v1837_v24  ;;  %v1727_v27 = vpop.permute.xlu1 %1726 }
 0x3f5   : > { %2108 = vmatpush1.bf16.msra.mxu0 %v3388_v22  ;;  %3089 = vmatprep.mubr.msk.bf16.mxu0 %vm217_vm0, %v1840_v26  ;;  %1747 = vst.msk [vmem:[#allocation3 + $0x90] sm:$0xff] %vm316_vm2, %v1727_v27 }
 0x3f6   : > { %2109 = vmatprep.subr.bf16.mxu0 %v3411_v2  ;;  %v2174_v31 = vld [vmem:[#allocation3 + $0x70] sm:$0xff] }
 0x3f7   : > { %v2184_v32 = vpack.c.bf16 %v2174_v31, %v1827_v21 }
 0x3f8   : > { %v1831_v36 = vld [vmem:[#allocation3 + $0x80] sm:$0xff] }
 0x3f9   : > { %2110 = vmatpush1.bf16.msra.mxu0 %v3390_v28  ;;  %2346 = vmatmul.mubr.bf16.vlgmr.msra.gmra.mrb[32].mxu1 %v2184_v32  ;;  %v1839_v39 = vpack.c.bf16 %v1831_v36, %v2174_v31 }
 0x3fa   : > { %2111 = vmatprep.subr.bf16.mxu0 %v3411_v2  ;;  %3145 = vmatprep.mubr.msk.bf16.mxu1 %vm217_vm0, %v2187_v34  ;;  %v1768_v41 = vld [vmem:[#allocation3] sm:$0xff] }
 0x3fb   : > { %2388 = vst.msk [vmem:[#allocation3] sm:$0xff] %vm217_vm0, %v4144_v17  ;;  %v3394_v17 = vld [vmem:[%s4531_s1 + $0x288] sm:$0xff]   ;;  %v1784_v49 = vpack.c.bf16 %v4195_v57, %v1768_v41 }
 0x3fc   : > { %2007 = vmatmul.mubr.bf16.gmra.mrb[28].mxu0 %v1839_v39  ;;  %v2178_v44 = vld [vmem:[#allocation3 + $0x90] sm:$0xff] }
 0x3fd   : > { %2112 = vmatpush1.bf16.msra.mxu0 %v3391_v38  ;;  %3102 = vmatprep.mubr.msk.bf16.mxu0 %vm217_vm0, %v1785_v40  ;;  %2397 = vst.msk [vmem:[#allocation3 + $0x90] sm:$0xff] %vm217_vm0, %v4152_v23  ;;  %v2186_v48 = vpack.c.bf16 %v2178_v44, %v1831_v36  ;;  %v3395_v23 = vld [vmem:[%s4531_s1 + $0x290] sm:$0xff]  }
 0x3fe   : > { %2113 = vmatprep.subr.bf16.mxu0 %v3411_v2 }
 0x401   : > { %2114 = vmatpush1.bf16.msra.mxu0 %v3392_v30  ;;  %2354 = vmatmul.mubr.bf16.gmra.mrb[36].mxu1 %v2186_v48  ;;  %v2496_v48 = vlaneseq }
 0x402   : > { %2115 = vmatprep.subr.bf16.mxu0 %v3411_v2 }
 0x405   : > { %2116 = vmatpush1.bf16.msra.mxu0 %v3393_v46  ;;  %v2497_v46 = vshrl.u32 %v2496_v48, 7 }
 0x406   : > { %2117 = vmatprep.subr.bf16.mxu0 %v3411_v2 }
 0x409   : > { %2118 = vmatpush1.bf16.msra.mxu0 %v3394_v17  ;;  %v2502_v17 = vsub.s32 1, %v2497_v46 }
 0x40a   : > { %2119 = vmatprep.subr.bf16.mxu0 %v3411_v2 }
 0x40d   : > { %2120 = vmatpush1.bf16.msra.mxu0 %v3395_v23  ;;  %v2494_v23 = vld [vmem:[%s4532_s2] sm:$0x3] }
 0x40e   : > { %2121 = vmatprep.subr.bf16.mxu0 %v3411_v2 }
 0x411   : > { %2122 = vmatpush1.bf16.msra.mxu0 %v3396_v37  ;;  %v2479_v37 = vld [vmem:[#allocation3 + $0x8] sm:$0xff] }
 0x412   : > { %2297 = vmatprep.subr.bf16.mxu0 %v3411_v2 }
 0x414   : > { %2132 = vmatmul.mubr.bf16.vlgmr.msra.gmra.mrb[16].mxu0 %v1784_v49  ;;  %v2498_v49 = vsub.s32 0, %v2497_v46 }
 0x415   : > { %3103 = vmatprep.mubr.msk.bf16.mxu0 %vm217_vm0, %v1787_v51  ;;  %2298 = vmatpush1.bf16.msra.mxu0 %v4005_v7  ;;  %v1788_v7 = vpack.c.bf16 %v4235_v20, %v4217_v8 }
 0x416   : > { %2299 = vmatprep.subr.bf16.mxu0 %v3411_v2 }
 0x419   : > { %2300 = vmatpush1.bf16.msra.mxu0 %v4012_v42  ;;  %v2419_v42 = vpop.permute.xlu0 %2418 }
 0x41a   : > { %2301 = vmatprep.subr.bf16.mxu0 %v3411_v2  ;;  %2448 = vst.msk [vmem:[#allocation3] sm:$0xff] %vm316_vm2, %v2419_v42 }
 0x41c   : > { %2140 = vmatmul.mubr.bf16.gmra.mrb[20].mxu0 %v1786_v53 }
 0x41d   : > { %3104 = vmatprep.mubr.msk.bf16.mxu0 %vm217_vm0, %v1789_v54  ;;  %2302 = vmatpush1.bf16.msra.mxu0 %v4023_v33 }
 0x41e   : > { %2303 = vmatprep.subr.bf16.mxu0 %v3411_v2 }
 0x421   : > { %2304 = vmatpush1.bf16.msra.mxu0 %v4034_v35 }
 0x422   : > { %2305 = vmatprep.subr.bf16.mxu0 %v3411_v2 }
 0x424   : > { %2148 = vmatmul.mubr.bf16.gmra.mrb[24].mxu0 %v1788_v7 }
 0x425   : > { %3105 = vmatprep.mubr.msk.bf16.mxu0 %vm217_vm0, %v4185_v50  ;;  %2306 = vmatpush1.bf16.msra.mxu0 %v4067_v43 }
 0x426   : > { %2307 = vmatprep.subr.bf16.mxu0 %v3411_v2 }
 0x429   : > { %2308 = vmatpush1.bf16.msra.mxu0 %v4076_v45 }
 0x42a   : > { %2309 = vmatprep.subr.bf16.mxu0 %v3411_v2 }
 0x42c   : > { %2156 = vmatmul.mubr.bf16.gmra.mrb[28].mxu0 %v2184_v32 }
 0x42d   : > { %2310 = vmatpush1.bf16.msra.mxu0 %v4091_v52  ;;  %3142 = vmatprep.mubr.msk.bf16.mxu0 %vm217_vm0, %v1787_v51  ;;  %v4360_v51 = vrot.slane %v2494_v23, %v2502_v17 }
 0x42e   : > { %2311 = vmatprep.subr.bf16.mxu0 %v3411_v2 }
 0x431   : > { %2312 = vmatpush1.bf16.msra.mxu0 %v4106_v1 }
 0x432   : > { %2313 = vmatprep.subr.bf16.mxu0 %v3411_v2 }
 0x435   : > { %2314 = vmatpush1.bf16.msra.mxu0 %v4113_v3 }
 0x436   : > { %2315 = vmatprep.subr.bf16.mxu0 %v3411_v2 }
 0x439   : > { %2316 = vmatpush1.bf16.msra.mxu0 %v4133_v15 }
 0x43a   : > { %2317 = vmatprep.subr.bf16.mxu0 %v3411_v2 }
 0x43d   : > { %2318 = vmatpush1.bf16.msra.mxu0 %v4142_v16 }
 0x43e   : > { %2319 = vmatprep.subr.bf16.mxu0 %v3411_v2 }
 0x441   : > { %2320 = vmatpush1.bf16.msra.mxu0 %v4164_v29 }
 0x444   : > { %2330 = vmatmul.mubr.bf16.vlgmr.msra.gmra.mrb[16].mxu0 %v1786_v53  ;;  %v2478_v53 = vld [vmem:[#allocation3] sm:$0xff] }
 0x445   : > { %3143 = vmatprep.mubr.msk.bf16.mxu0 %vm217_vm0, %v1789_v54  ;;  %v2507_v54 = vmul.f32 %v4360_v51, %v2479_v37 }
 0x44c   : > { %2338 = vmatmul.mubr.bf16.gmra.mrb[20].mxu0 %v1788_v7  ;;  %v4363_v7 = vrot.slane %v2494_v23, %v2498_v49 }
 0x44e   : > { %v2506_v42 = vmul.f32 %v4363_v7, %v2478_v53 }
 0x4cc   : > { %v2347_v33 = vpop.f32.mrb[32].mxu1 }
 0x4cd   : > { %v2349_v35 = vpop.f32.mrb[33].mxu1 }
 0x4ce   : > { %v2350_v43 = vpop.f32.mrb[34].mxu1 }
 0x4cf   : > { %v2352_v45 = vpop.f32.mrb[35].mxu1 }
 0x4d4   : > { %v2355_v52 = vpop.f32.mrb[36].mxu1 }
 0x4d5   : > { %v2357_v1 = vpop.f32.mrb[37].mxu1 }
 0x4d6   : > { %v2358_v3 = vpop.f32.mrb[38].mxu1 }
 0x4d7   : > { %v2360_v12 = vpop.f32.mrb[39].mxu1 }
 0x4f7   : > { %v2149_v15 = vpop.f32.mrb[24].mxu0 }
 0x4f8   : > { %v3202_v16 = vadd.f32 %v2347_v33, %v2149_v15  ;;  %v2151_v2 = vpop.f32.mrb[25].mxu0 }
 0x4f9   : > { %v2152_v50 = vpop.f32.mrb[26].mxu0 }
 0x4fa   : > { %2374 = vst.msk [vmem:[#allocation2 + $0x80] sm:$0xff] %vm217_vm0, %v3202_v16  ;;  %v3203_v29 = vadd.f32 %v2350_v43, %v2152_v50  ;;  %v2154_v55 = vpop.f32.mrb[27].mxu0  ;;  %v3146_v43 = vld [vmem:[%s4532_s2 + $0x2] sm:$0x3] }
 0x4fb   : > { %v4374_v1 = vrot.slane %v3146_v43, %v2502_v17  ;;  %v4379_v12 = vrot.slane %v3146_v43, %v2498_v49 }
 0x4fc   : > { %2375 = vst.msk [vmem:[#allocation2 + $0x98] sm:$0xff] %vm217_vm0, %v3203_v29 }
 0x4ff   : > { %v2157_v56 = vpop.f32.mrb[28].mxu0 }
 0x500   : > { %v3204_v57 = vadd.f32 %v2355_v52, %v2157_v56  ;;  %v2159_v58 = vpop.f32.mrb[29].mxu0 }
 0x501   : > { %v2160_v59 = vpop.f32.mrb[30].mxu0  ;;  %v2383_v60 = vld [vmem:[#allocation2 + $0x7f] sm:$0xff] }
 0x502   : > { %v2463_v62 = vld [vmem:[#allocation2 + $0x81] sm:$0xff]  ;;  %2376 = vst.msk [vmem:[#allocation2 + $0xb0] sm:$0xff] %vm217_vm0, %v3204_v57  ;;  %v3205_v63 = vadd.f32 %v2358_v3, %v2160_v59  ;;  %v2162_v5 = vpop.f32.mrb[31].mxu0  ;;  %2393 = vst.msk [vmem:[#allocation3 + $0x50] sm:$0xff] %vm217_vm0, %v2383_v60 }
 0x503   : > { %2473 = vst.msk [vmem:[#allocation3 + $0x58] sm:$0xff] %vm217_vm0, %v2463_v62  ;;  %v2384_v6 = vld [vmem:[#allocation2 + $0x97] sm:$0xff]  ;;  %v2403_v40 = vld [vmem:[#allocation2 + $0x80] sm:$0xff] }
 0x504   : > { %v2464_v4 = vld [vmem:[#allocation2 + $0x99] sm:$0xff]  ;;  %2377 = vst.msk [vmem:[#allocation2 + $0xc8] sm:$0xff] %vm217_vm0, %v3205_v63  ;;  %2394 = vst.msk [vmem:[#allocation3 + $0x60] sm:$0xff] %vm217_vm0, %v2384_v6  ;;  %v3147_v3 = vld [vmem:[%s4532_s2 + $0x4] sm:$0x3] }
 0x505   : > { %2474 = vst.msk [vmem:[#allocation3 + $0x68] sm:$0xff] %vm217_vm0, %v2464_v4  ;;  %v2404_v41 = vld [vmem:[#allocation2 + $0x98] sm:$0xff]  ;;  %v4385_v2 = vrot.slane %v3147_v3, %v2502_v17  ;;  %v4387_v29 = vrot.slane %v3147_v3, %v2498_v49 }
 0x509   : > { %v2385_v61 = vld [vmem:[#allocation2 + $0xaf] sm:$0xff] }
 0x50a   : > { %2395 = vst.msk [vmem:[#allocation3 + $0x70] sm:$0xff] %vm217_vm0, %v2385_v61  ;;  %v2465_v8 = vld [vmem:[#allocation2 + $0xb1] sm:$0xff]  ;;  %v2571_v57 = vld [vmem:[#allocation3 + $0x58] sm:$0xff] }
 0x50b   : > { %v2386_v10 = vld [vmem:[#allocation2 + $0xc7] sm:$0xff]  ;;  %2475 = vst.msk [vmem:[#allocation3 + $0x78] sm:$0xff] %vm217_vm0, %v2465_v8  ;;  %v2405_v30 = vld [vmem:[#allocation2 + $0xb0] sm:$0xff]  ;;  %v2600_v8 = vmul.f32 %v4374_v1, %v2571_v57 }
 0x50c   : > { %2396 = vst.msk [vmem:[#allocation3 + $0x80] sm:$0xff] %vm217_vm0, %v2386_v10  ;;  %v2466_v9 = vld [vmem:[#allocation2 + $0xc9] sm:$0xff] }
 0x50d   : > { %2476 = vst.msk [vmem:[#allocation3 + $0x88] sm:$0xff] %vm217_vm0, %v2466_v9  ;;  %v2406_v44 = vld [vmem:[#allocation2 + $0xc8] sm:$0xff] }
 0x517   : > { %v2331_v11 = vpop.f32.mrb[16].mxu0 }
 0x518   : > { %2370 = vst.msk [vmem:[#allocation2 + $0x20] sm:$0xff] %vm217_vm0, %v2331_v11  ;;  %v2333_v13 = vpop.f32.mrb[17].mxu0  ;;  %v2683_v11 = vmul.f32 %v4385_v2, %v2571_v57 }
 0x519   : > { %v2334_v14 = vpop.f32.mrb[18].mxu0 }
 0x51a   : > { %2371 = vst.msk [vmem:[#allocation2 + $0x38] sm:$0xff] %vm217_vm0, %v2334_v14  ;;  %v2336_v0 = vpop.f32.mrb[19].mxu0 }
 0x51f   : > { %v2339_v18 = vpop.f32.mrb[20].mxu0  ;;  %v2399_v19 = vld [vmem:[#allocation2 + $0x20] sm:$0xff] }
 0x520   : > { %v2379_v20 = vld [vmem:[#allocation2 + $0x1f] sm:$0xff]  ;;  %2372 = vst.msk [vmem:[#allocation2 + $0x50] sm:$0xff] %vm217_vm0, %v2339_v18  ;;  %2420 = vrot.lane.b32.xlu1 %v2399_v19, %s3412_s8  ;;  %v2341_v22 = vpop.f32.mrb[21].mxu0  ;;  %v2517_v19 = vmul.f32 %v2571_v57, %v4360_v51 }
 0x521   : > { %v2459_v21 = vld [vmem:[#allocation2 + $0x21] sm:$0xff]  ;;  %2389 = vst.msk [vmem:[#allocation3 + $0x10] sm:$0xff] %vm217_vm0, %v2379_v20  ;;  %v2342_v24 = vpop.f32.mrb[22].mxu0  ;;  %v2400_v25 = vld [vmem:[#allocation2 + $0x38] sm:$0xff] }
 0x522   : > { %2469 = vst.msk [vmem:[#allocation3 + $0x18] sm:$0xff] %vm217_vm0, %v2459_v21  ;;  %v2380_v26 = vld [vmem:[#allocation2 + $0x37] sm:$0xff]  ;;  %2373 = vst.msk [vmem:[#allocation2 + $0x68] sm:$0xff] %vm217_vm0, %v2342_v24  ;;  %2422 = vrot.lane.b32.xlu0 %v2400_v25, %s3412_s8  ;;  %v2344_v28 = vpop.f32.mrb[23].mxu0 }
 0x523   : > { %v2460_v27 = vld [vmem:[#allocation2 + $0x39] sm:$0xff]  ;;  %2390 = vst.msk [vmem:[#allocation3 + $0x20] sm:$0xff] %vm217_vm0, %v2380_v26  ;;  %v2623_v26 = vsel %vm217_vm0, %v2600_v8, 0.0 }
 0x524   : > { %2470 = vst.msk [vmem:[#allocation3 + $0x28] sm:$0xff] %vm217_vm0, %v2460_v27  ;;  %v2573_v24 = vld [vmem:[#allocation3 + $0x68] sm:$0xff] }
 0x525   : > { %v2685_v46 = vmul.f32 %v4385_v2, %v2573_v24  ;;  %v2519_v53 = vmul.f32 %v2573_v24, %v4360_v51 }
 0x527   : > { %v2401_v31 = vld [vmem:[#allocation2 + $0x50] sm:$0xff]  ;;  %v2708_v8 = vsel %vm217_vm0, %v2685_v46, 0.0 }
 0x528   : > { %v2381_v32 = vld [vmem:[#allocation2 + $0x4f] sm:$0xff]  ;;  %2424 = vrot.lane.b32.xlu1 %v2401_v31, %s3412_s8  ;;  %v2704_v31 = vsel %vm217_vm0, %v2683_v11, 0.0 }
 0x529   : > { %2391 = vst.msk [vmem:[#allocation3 + $0x30] sm:$0xff] %vm217_vm0, %v2381_v32  ;;  %v2461_v34 = vld [vmem:[#allocation2 + $0x51] sm:$0xff]  ;;  %v2402_v36 = vld [vmem:[#allocation2 + $0x68] sm:$0xff] }
 0x52a   : > { %v2382_v38 = vld [vmem:[#allocation2 + $0x67] sm:$0xff]  ;;  %2471 = vst.msk [vmem:[#allocation3 + $0x38] sm:$0xff] %vm217_vm0, %v2461_v34  ;;  %2426 = vrot.lane.b32.xlu0 %v2402_v36, %s3412_s8 }
 0x52b   : > { %2392 = vst.msk [vmem:[#allocation3 + $0x40] sm:$0xff] %vm217_vm0, %v2382_v38  ;;  %v2462_v39 = vld [vmem:[#allocation2 + $0x69] sm:$0xff]  ;;  %v4381_v15 = vld [vmem:[#allocation3 + $0x28] sm:$0xff] }
 0x52c   : > { %2472 = vst.msk [vmem:[#allocation3 + $0x48] sm:$0xff] %vm217_vm0, %v2462_v39  ;;  %2428 = vrot.lane.b32.xlu1 %v2403_v40, %s3412_s8  ;;  %v4372_v52 = vld [vmem:[#allocation3 + $0x18] sm:$0xff]  ;;  %v2594_v56 = vmul.f32 %v4374_v1, %v4381_v15  ;;  %v2677_v59 = vmul.f32 %v4385_v2, %v4381_v15  ;;  %v2542_v40 = vsel %vm217_vm0, %v2517_v19, 0.0 }
 0x52d   : > { %v2592_v16 = vmul.f32 %v4374_v1, %v4372_v52  ;;  %v4434_v32 = vld [vmem:[#allocation3 + $0x78] sm:$0xff] }
 0x52e   : > { %2430 = vrot.lane.b32.xlu0 %v2404_v41, %s3412_s8  ;;  %v2611_v10 = vsel %vm217_vm0, %v2594_v56, 0.0  ;;  %v2692_v14 = vsel %vm217_vm0, %v2677_v59, 0.0  ;;  %v2602_v41 = vmul.f32 %v4374_v1, %v2573_v24  ;;  %v2687_v59 = vmul.f32 %v4385_v2, %v4434_v32 }
 0x52f   : > { %v2607_v62 = vsel %vm217_vm0, %v2592_v16, 0.0  ;;  %v2660_v16 = vld [vmem:[#allocation3 + $0x88] sm:$0xff] }
 0x530   : > { %2432 = vrot.lane.b32.xlu1 %v2405_v30, %s3412_s8  ;;  %v2689_v11 = vmul.f32 %v4385_v2, %v2660_v16 }
 0x531   : > { %v4406_v4 = vld [vmem:[#allocation3 + $0x38] sm:$0xff] }
 0x532   : > { %2434 = vrot.lane.b32.xlu0 %v2406_v44, %s3412_s8  ;;  %v2596_v21 = vmul.f32 %v4374_v1, %v4406_v4  ;;  %v2679_v22 = vmul.f32 %v4385_v2, %v4406_v4 }
 0x533   : > { %v4417_v0 = vld [vmem:[#allocation3 + $0x48] sm:$0xff] }
 0x534   : > { %2436 = vrot.lane.b32.xlu1 %v4179_v47, %s3412_s8  ;;  %v2522_v47 = vsel %vm217_vm0, %v2507_v54, 0.0  ;;  %v2681_v28 = vmul.f32 %v4385_v2, %v4417_v0  ;;  %v2598_v38 = vmul.f32 %v4417_v0, %v4374_v1  ;;  %v2615_v30 = vsel %vm217_vm0, %v2596_v21, 0.0 }
 0x535   : > { %v2523_v33 = vadd.f32 %v2522_v47, %v2506_v42  ;;  %v2696_v44 = vsel %vm217_vm0, %v2679_v22, 0.0  ;;  %v2604_v54 = vmul.f32 %v4374_v1, %v4434_v32 }
 0x536   : > { %v2700_v47 = vsel %vm217_vm0, %v2681_v28, 0.0  ;;  %v2619_v3 = vsel %vm217_vm0, %v2598_v38, 0.0 }
 0x537   : > { %v2631_v22 = vsel %vm217_vm0, %v2604_v54, 0.0 }
 0x551   : > { %2524 = vadd.xlane.f32.xlu0 %v2523_v33 }
 0x592   : > { %v2421_v35 = vpop.permute.xlu1 %2420 }
 0x593   : > { %2449 = vst.msk [vmem:[#allocation3 + $0x10] sm:$0xff] %vm316_vm2, %v2421_v35 }
 0x594   : > { %v2423_v45 = vpop.permute.xlu0 %2422 }
 0x595   : > { %2450 = vst.msk [vmem:[#allocation3 + $0x20] sm:$0xff] %vm316_vm2, %v2423_v45 }
 0x59a   : > { %v2425_v50 = vpop.permute.xlu1 %2424  ;;  %v4389_v55 = vld [vmem:[#allocation3 + $0x10] sm:$0xff] }
 0x59b   : > { %2451 = vst.msk [vmem:[#allocation3 + $0x30] sm:$0xff] %vm316_vm2, %v2425_v50  ;;  %v2591_v58 = vmul.f32 %v4379_v12, %v4389_v55  ;;  %v2662_v50 = vld [vmem:[#allocation3 + $0x98] sm:$0xff] }
 0x59c   : > { %v2427_v60 = vpop.permute.xlu0 %2426  ;;  %v4399_v63 = vld [vmem:[#allocation3 + $0x20] sm:$0xff] }
 0x59d   : > { %2452 = vst.msk [vmem:[#allocation3 + $0x40] sm:$0xff] %vm316_vm2, %v2427_v60  ;;  %v4402_v5 = vadd.f32 %v2607_v62, %v2591_v58  ;;  %v2593_v6 = vmul.f32 %v4379_v12, %v4399_v63  ;;  %v2676_v9 = vmul.f32 %v4387_v29, %v4399_v63  ;;  %v2627_v58 = vsel %vm217_vm0, %v2602_v41, 0.0 }
 0x59e   : > { %v2429_v61 = vpop.permute.xlu1 %2428 }
 0x59f   : > { %2453 = vst.msk [vmem:[#allocation3 + $0x50] sm:$0xff] %vm316_vm2, %v2429_v61  ;;  %v4414_v13 = vadd.f32 %v2611_v10, %v2593_v6  ;;  %v4420_v20 = vadd.f32 %v2692_v14, %v2676_v9  ;;  %v2606_v14 = vmul.f32 %v2660_v16, %v4374_v1 }
 0x5a0   : > { %v2431_v18 = vpop.permute.xlu0 %2430 }
 0x5a1   : > { %2454 = vst.msk [vmem:[#allocation3 + $0x60] sm:$0xff] %vm316_vm2, %v2431_v18  ;;  %v2691_v18 = vmul.f32 %v4385_v2, %v2662_v50  ;;  %v2635_v41 = vsel %vm217_vm0, %v2606_v14, 0.0 }
 0x5a2   : > { %v2433_v25 = vpop.permute.xlu1 %2432  ;;  %v4428_v27 = vld [vmem:[#allocation3 + $0x30] sm:$0xff] }
 0x5a3   : > { %2455 = vst.msk [vmem:[#allocation3 + $0x70] sm:$0xff] %vm316_vm2, %v2433_v25  ;;  %v2595_v34 = vmul.f32 %v4379_v12, %v4428_v27  ;;  %v2678_v36 = vmul.f32 %v4387_v29, %v4428_v27 }
 0x5a4   : > { %v2435_v39 = vpop.permute.xlu0 %2434  ;;  %v4446_v48 = vld [vmem:[#allocation3 + $0x40] sm:$0xff] }
 0x5a5   : > { %2456 = vst.msk [vmem:[#allocation3 + $0x80] sm:$0xff] %vm316_vm2, %v2435_v39  ;;  %v4450_v17 = vadd.f32 %v2615_v30, %v2595_v34  ;;  %v4452_v23 = vadd.f32 %v2696_v44, %v2678_v36  ;;  %v2680_v37 = vmul.f32 %v4387_v29, %v4446_v48  ;;  %v2597_v33 = vmul.f32 %v4446_v48, %v4379_v12 }
 0x5a6   : > { %v2570_v49 = vld [vmem:[#allocation3 + $0x50] sm:$0xff]  ;;  %v2437_v42 = vpop.permute.xlu1 %2436  ;;  %v2716_v39 = vsel %vm217_vm0, %v2689_v11, 0.0  ;;  %v2720_v44 = vsel %vm217_vm0, %v2691_v18, 0.0 }
 0x5a7   : > { %v2599_v35 = vmul.f32 %v4379_v12, %v2570_v49  ;;  %v2682_v43 = vmul.f32 %v4387_v29, %v2570_v49  ;;  %2457 = vst.msk [vmem:[#allocation3 + $0x90] sm:$0xff] %vm316_vm2, %v2437_v42  ;;  %v4465_v45 = vadd.f32 %v2700_v47, %v2680_v37  ;;  %v2516_v56 = vmul.f32 %v2570_v49, %v4363_v7 }
 0x5a8   : > { %v2572_v57 = vld [vmem:[#allocation3 + $0x60] sm:$0xff]  ;;  %v4472_v60 = vadd.f32 %v2619_v3, %v2597_v33  ;;  %v2546_v49 = vsel %vm217_vm0, %v2519_v53, 0.0  ;;  %v2508_v47 = vmul.f32 %v4363_v7, %v4389_v55  ;;  %v2510_v53 = vmul.f32 %v4363_v7, %v4399_v63 }
 0x5a9   : > { %v2624_v62 = vadd.f32 %v2623_v26, %v2599_v35  ;;  %v2705_v6 = vadd.f32 %v2704_v31, %v2682_v43  ;;  %v2601_v61 = vmul.f32 %v4379_v12, %v2572_v57  ;;  %v2684_v10 = vmul.f32 %v4387_v29, %v2572_v57 }
 0x5aa   : > { %v2574_v9 = vld [vmem:[#allocation3 + $0x70] sm:$0xff]  ;;  %v2543_v25 = vadd.f32 %v2542_v40, %v2516_v56  ;;  %v2518_v28 = vmul.f32 %v2572_v57, %v4363_v7  ;;  %v2712_v31 = vsel %vm217_vm0, %v2687_v59, 0.0  ;;  %v2511_v35 = vmul.f32 %v4360_v51, %v4381_v15 }
 0x5ab   : > { %2625 = vadd.xlane.f32.xlu1 %v2624_v62  ;;  %2706 = vadd.xlane.f32.xlu0 %v2705_v6  ;;  %v2628_v19 = vadd.f32 %v2627_v58, %v2601_v61  ;;  %v2603_v21 = vmul.f32 %v4379_v12, %v2574_v9  ;;  %v2686_v24 = vmul.f32 %v4387_v29, %v2574_v9 }
 0x5ac   : > { %v2709_v26 = vadd.f32 %v2708_v8, %v2684_v10  ;;  %v2659_v34 = vld [vmem:[#allocation3 + $0x80] sm:$0xff]  ;;  %v2547_v54 = vadd.f32 %v2546_v49, %v2518_v28  ;;  %v2530_v43 = vsel %vm217_vm0, %v2511_v35, 0.0  ;;  %v2513_v55 = vmul.f32 %v4406_v4, %v4360_v51 }
 0x5ad   : > { %v2632_v36 = vadd.f32 %v2631_v22, %v2603_v21  ;;  %v2713_v1 = vadd.f32 %v2712_v31, %v2686_v24  ;;  %v2688_v2 = vmul.f32 %v4387_v29, %v2659_v34  ;;  %v2605_v38 = vmul.f32 %v2659_v34, %v4379_v12 }
 0x5ae   : > { %v2661_v30 = vld [vmem:[#allocation3 + $0x90] sm:$0xff]  ;;  %v2509_v12 = vmul.f32 %v4360_v51, %v4372_v52  ;;  %v2531_v52 = vadd.f32 %v2530_v43, %v2510_v53  ;;  %v2512_v3 = vmul.f32 %v4428_v27, %v4363_v7  ;;  %v2534_v15 = vsel %vm217_vm0, %v2513_v55, 0.0 }
 0x5af   : > { %2544 = vadd.xlane.f32.xlu1 %v2543_v25  ;;  %2629 = vadd.xlane.f32.xlu0 %v2628_v19  ;;  %v2717_v40 = vadd.f32 %v2716_v39, %v2688_v2  ;;  %v2636_v46 = vadd.f32 %v2635_v41, %v2605_v38  ;;  %v2690_v37 = vmul.f32 %v4387_v29, %v2661_v30  ;;  %v2746_v55 = vstv %s2745_s27 }
 0x5b0   : > { %v2526_v33 = vsel %vm217_vm0, %v2509_v12, 0.0  ;;  %v2535_v63 = vadd.f32 %v2534_v15, %v2512_v3  ;;  %v2520_v4 = vmul.f32 %v2574_v9, %v4363_v7  ;;  %v2514_v27 = vmul.f32 %v4446_v48, %v4363_v7 }
 0x5b1   : > { %v2721_v42 = vadd.f32 %v2720_v44, %v2690_v37  ;;  %v2527_v29 = vadd.f32 %v2526_v33, %v2508_v47 }
 0x5b3   : > { %2710 = vadd.xlane.f32.xlu1 %v2709_v26  ;;  %2548 = vadd.xlane.f32.xlu0 %v2547_v54 }
 0x5b7   : > { %2633 = vadd.xlane.f32.xlu1 %v2632_v36  ;;  %2714 = vadd.xlane.f32.xlu0 %v2713_v1 }
 0x5bb   : > { %2528 = vadd.xlane.f32.xlu1 %v2527_v29  ;;  %2609 = vadd.xlane.f32.xlu0 %v4402_v5  ;;  %v2521_v5 = vmul.f32 %v4434_v32, %v4360_v51 }
 0x5bf   : > { %2532 = vadd.xlane.f32.xlu1 %v2531_v52  ;;  %2613 = vadd.xlane.f32.xlu0 %v4414_v13  ;;  %v2515_v13 = vmul.f32 %v4417_v0, %v4360_v51 }
 0x5c3   : > { %2694 = vadd.xlane.f32.xlu1 %v4420_v20  ;;  %2617 = vadd.xlane.f32.xlu0 %v4450_v17  ;;  %v2550_v20 = vsel %vm217_vm0, %v2521_v5, 0.0  ;;  %v2538_v17 = vsel %vm217_vm0, %v2515_v13, 0.0 }
 0x5c4   : > { %v2539_v16 = vadd.f32 %v2538_v17, %v2514_v27 }
 0x5c7   : > { %2536 = vadd.xlane.f32.xlu1 %v2535_v63  ;;  %2698 = vadd.xlane.f32.xlu0 %v4452_v23  ;;  %v2551_v23 = vadd.f32 %v2550_v20, %v2520_v4 }
 0x5cb   : > { %2702 = vadd.xlane.f32.xlu1 %v4465_v45  ;;  %2621 = vadd.xlane.f32.xlu0 %v4472_v60 }
 0x5cf   : > { %2552 = vadd.xlane.f32.xlu1 %v2551_v23  ;;  %2540 = vadd.xlane.f32.xlu0 %v2539_v16 }
 0x5d3   : > { %2718 = vadd.xlane.f32.xlu1 %v2717_v40  ;;  %2637 = vadd.xlane.f32.xlu0 %v2636_v46 }
 0x5d7   : > { %2722 = vadd.xlane.f32.xlu0 %v2721_v42 }
 0x5de   : > { %v2525_v51 = vpop.xlane.xlu0 %2524 }
 0x638   : > { %v2626_v0 = vpop.xlane.xlu1 %2625  ;;  %v2707_v32 = vpop.xlane.xlu0 %2706 }
 0x63c   : > { %v2545_v50 = vpop.xlane.xlu1 %2544  ;;  %v2630_v7 = vpop.xlane.xlu0 %2629 }
 0x63d   : > { %v2644_v2 = vadd.f32 %v2630_v7, %v2545_v50 }
 0x640   : > { %v2711_v48 = vpop.xlane.xlu1 %2710  ;;  %v2549_v45 = vpop.xlane.xlu0 %2548 }
 0x644   : > { %v2634_v56 = vpop.xlane.xlu1 %2633  ;;  %v2715_v57 = vpop.xlane.xlu0 %2714 }
 0x645   : > { %v2645_v44 = vadd.f32 %v2634_v56, %v2549_v45  ;;  %v2729_v40 = vadd.f32 %v2715_v57, %v2644_v2 }
 0x648   : > { %v2529_v58 = vpop.xlane.xlu1 %2528  ;;  %v2610_v59 = vpop.xlane.xlu0 %2609 }
 0x649   : > { %v2639_v11 = vadd.f32 %v2610_v59, %v2525_v51 }
 0x64c   : > { %v2533_v60 = vpop.xlane.xlu1 %2532  ;;  %v2614_v62 = vpop.xlane.xlu0 %2613 }
 0x64d   : > { %v2640_v8 = vadd.f32 %v2614_v62, %v2529_v58 }
 0x650   : > { %v2695_v6 = vpop.xlane.xlu1 %2694  ;;  %v2618_v61 = vpop.xlane.xlu0 %2617 }
 0x651   : > { %v2724_v18 = vadd.f32 %v2695_v6, %v2639_v11  ;;  %v2641_v19 = vadd.f32 %v2618_v61, %v2533_v60 }
 0x654   : > { %v2537_v10 = vpop.xlane.xlu1 %2536  ;;  %v2699_v9 = vpop.xlane.xlu0 %2698 }
 0x655   : > { %v2725_v14 = vadd.f32 %v2699_v9, %v2640_v8 }
 0x657   : > { %v2732_v24 = vadd.f32 %v2725_v14, %v2724_v18 }
 0x658   : > { %v2703_v21 = vpop.xlane.xlu1 %2702  ;;  %v2622_v22 = vpop.xlane.xlu0 %2621 }
 0x659   : > { %v2726_v25 = vadd.f32 %v2703_v21, %v2641_v19  ;;  %v2642_v26 = vadd.f32 %v2622_v22, %v2537_v10 }
 0x65b   : > { %v2733_v28 = vadd.f32 %v2732_v24, %v2726_v25  ;;  %v2727_v31 = vadd.f32 %v2707_v32, %v2642_v26 }
 0x65c   : > { %v2553_v34 = vpop.xlane.xlu1 %2552  ;;  %v2541_v36 = vpop.xlane.xlu0 %2540 }
 0x65d   : > { %v2643_v1 = vadd.f32 %v2626_v0, %v2541_v36  ;;  %v2734_v38 = vadd.f32 %v2733_v28, %v2727_v31 }
 0x65f   : > { %v2728_v39 = vadd.f32 %v2711_v48, %v2643_v1 }
 0x660   : > { %v2719_v41 = vpop.xlane.xlu1 %2718  ;;  %v2638_v30 = vpop.xlane.xlu0 %2637 }
 0x661   : > { %v2735_v46 = vadd.f32 %v2734_v38, %v2728_v39  ;;  %v2730_v37 = vadd.f32 %v2719_v41, %v2645_v44  ;;  %v2646_v54 = vadd.f32 %v2638_v30, %v2553_v34 }
 0x663   : > { %v2736_v49 = vadd.f32 %v2735_v46, %v2729_v40 }
 0x664   : > { %v2723_v42 = vpop.xlane.xlu0 %2722 }
 0x665   : > { %v2737_v12 = vadd.f32 %v2736_v49, %v2730_v37  ;;  %v2731_v47 = vadd.f32 %v2723_v42, %v2646_v54 }
 0x667   : > { %v2738_v33 = vadd.f32 %v2737_v12, %v2731_v47 }
 0x669   : > { %v2739_v35 = vrot.slane %v2738_v33, 4 }
 0x66b   : > { %v2740_v29 = vadd.f32 %v2739_v35, %v2738_v33 }
 0x66d   : > { %v2741_v53 = vrot.slane %v2740_v29, 2 }
 0x66f   : > { %v2742_v43 = vadd.f32 %v2741_v53, %v2740_v29 }
 0x671   : > { %v2743_v52 = vrot.slane %v2742_v43, 1 }
 0x673   : > { %v2744_v3 = vadd.f32 %v2743_v52, %v2742_v43 }
 0x675   : > { %v2747_v15 = vadd.f32 %v2746_v55, %v2744_v3 }
 0x677   : > { %v2748_v63 = vsub.f32 0.0, %v2747_v15 }
 0x679   : > { %v2749_v5 = vmul.f32 1.442695, %v2748_v63 }
 0x67b   : > { %3397 = vpow2.f32 %v2749_v5 }
 0x685   : > { %v3398_v13 = vpop.eup %3397 }
 0x686   : > { %v2751_v4 = vadd.f32 1.0, %v3398_v13 }
 0x688   : > { %3399 = vrcp.f32 %v2751_v4 }
 0x692   : > { %v3400_v27 = vpop.eup %3399 }
 0x693   : > { %2755 = vst.msk [vmem:[%s194_s30] sm:$0x1] %vm2754_vm3, %v3400_v27 }
 0x694 PF: > { %s15_s17 = sadd.s32 1, %s3408_s17  }
 0x695   : > { %p12_p4 = scmp.ge.s32.totalorder %s15_s17, 4  }
 0x697   :  { %14 = sbr.rel (!%p12_p4) target bundleno = 2 (0x2), region = 80 }

</bundles_post_ra>
